<compile_context>
chip_gen: v7x
topology: tpu7x:2x2x1
jax: 0.10.0
libtpu: 0.0.40
codegen_flags: <defaults>
</compile_context>

<pallas_src>
import functools

import jax
import jax.numpy as jnp
from jax.experimental import pallas as pl
from jax.experimental.pallas import tpu as pltpu


# ---------------------------------------------------------------------------
# Pallas kernel: fused (skip add) + BatchNorm(eval) + ReLU + KxK 'same' conv
# ---------------------------------------------------------------------------
def _bn_relu_conv_kernel(*refs, ksize, width, hw, has_skip):
    # refs (in order):
    #   x_ref     (1, C_in, H*W)
    #   skip_ref  (1, C_in, H*W)              [only if has_skip]
    #   col_ref   (1, H*W) int32 column ids   [only if ksize > 1]
    #   scale_ref (C_in, 1)   folded BN scale = gamma / sqrt(var + eps)
    #   shift_ref (C_in, 1)   folded BN shift = beta - mean * scale
    #   w_ref     (k*k, C_out, C_in)  per-tap 1x1 weight matrices
    #   b_ref     (C_out, 1)  conv bias
    #   o_ref     (1, C_out, H*W)
    #   pad_ref   (C_in, H*W + 2*halo) VMEM scratch   [only if ksize > 1]
    it = iter(refs)
    x_ref = next(it)
    skip_ref = next(it) if has_skip else None
    col_ref = next(it) if ksize > 1 else None
    scale_ref = next(it)
    shift_ref = next(it)
    w_ref = next(it)
    b_ref = next(it)
    o_ref = next(it)
    pad_ref = next(it) if ksize > 1 else None

    c_in = x_ref.shape[1]
    c_out = o_ref.shape[1]
    r = ksize // 2

    x = x_ref[0]                                          # (C_in, HW)
    if has_skip:
        x = x + skip_ref[0]                               # fused residual add
    # BN (eval, folded) + ReLU on the VPU; broadcasts are per-channel (sublane).
    a = jnp.maximum(x * scale_ref[...] + shift_ref[...], 0.0)

    # Conv bias folded into the accumulator init (single hoisted broadcast).
    acc = jnp.broadcast_to(b_ref[...], (c_out, hw)).astype(jnp.float32)

    if ksize == 1:                                        # 1x1 conv: one matmul
        acc = acc + jnp.dot(w_ref[0], a, preferred_element_type=jnp.float32)
        o_ref[0] = acc.astype(o_ref.dtype)
        return

    # --- KxK conv as k*k shifted 1x1 convs ---------------------------------
    # Store the activation into a zero-padded scratch so row over/under-flow of
    # the flattened shifts lands on zeros (matches Conv2d zero padding).
    halo = r * (width + 1)                                # max |dh*W + dw|
    zero_halo = jnp.zeros((c_in, halo), jnp.float32)
    pad_ref[:, pl.ds(0, halo)] = zero_halo
    pad_ref[:, pl.ds(halo + hw, halo)] = zero_halo
    pad_ref[:, pl.ds(halo, hw)] = a

    col = col_ref[...]                                    # (1, HW) pixel column

    for dh in range(-r, r + 1):
        for dw in range(-r, r + 1):
            tap = (dh + r) * ksize + (dw + r)
            s = dh * width + dw                           # flattened shift
            sh = pad_ref[:, pl.ds(halo + s, hw)]          # A[:, h+dh, w+dw]
            # Column-boundary taps must not wrap across image rows.
            if dw < 0:
                sh = jnp.where(col >= -dw, sh, 0.0)
            elif dw > 0:
                sh = jnp.where(col < width - dw, sh, 0.0)
            acc = acc + jnp.dot(w_ref[tap], sh,           # MXU, lane-dense out
                                preferred_element_type=jnp.float32)
    o_ref[0] = acc.astype(o_ref.dtype)


def bn_relu_conv(x_nchw, params, *, skip_nchw=None, eps=1e-5):
    """_BNReluConv (eval-mode BN) with an optionally fused skip/residual add.

    Computes  conv_k(relu(bn(x [+ skip]))) + bias  in a single Pallas kernel,
    consuming/producing NCHW without any transpose.
    """
    w, b = params["w"], params["b"]
    n, c_in, h, wd = x_nchw.shape
    c_out, c_in_w, kh, kw = w.shape
    assert c_in_w == c_in and kh == kw
    k = int(kh)
    r = k // 2
    hw = h * wd
    f32 = jnp.float32

    # Fold BN running stats into per-channel scale/shift (eval semantics).
    scale = (params["gamma"] / jnp.sqrt(params["var"] + eps)).astype(f32)
    shift = params["beta"].astype(f32) - params["mean"].astype(f32) * scale
    scale = scale.reshape(c_in, 1)
    shift = shift.reshape(c_in, 1)
    # Per-tap (C_out, C_in) matrices; tap index = (dh+r)*k + (dw+r).
    w_taps = jnp.transpose(w.astype(f32), (2, 3, 0, 1)).reshape(k * k, c_out, c_in)
    bias = b.astype(f32).reshape(c_out, 1)

    # NCHW -> (N, C, H*W): free reshape, channels on sublanes, pixels on lanes.
    x_rows = x_nchw.reshape(n, c_in, hw)

    inputs = [x_rows]
    in_specs = [pl.BlockSpec((1, c_in, hw), lambda i: (i, 0, 0))]
    if skip_nchw is not None:
        inputs.append(skip_nchw.reshape(n, c_in, hw))
        in_specs.append(pl.BlockSpec((1, c_in, hw), lambda i: (i, 0, 0)))
    if k > 1:
        col_ids = (jnp.arange(hw, dtype=jnp.int32) % wd).reshape(1, hw)
        inputs.append(col_ids)
        in_specs.append(pl.BlockSpec((1, hw), lambda i: (0, 0)))
    inputs += [scale, shift, w_taps, bias]
    # Small parameters stay resident (constant index_map -> fetched once).
    in_specs += [
        pl.BlockSpec((c_in, 1), lambda i: (0, 0)),
        pl.BlockSpec((c_in, 1), lambda i: (0, 0)),
        pl.BlockSpec((k * k, c_out, c_in), lambda i: (0, 0, 0)),
        pl.BlockSpec((c_out, 1), lambda i: (0, 0)),
    ]
    scratch_shapes = []
    if k > 1:
        halo = r * (wd + 1)
        scratch_shapes.append(pltpu.VMEM((c_in, hw + 2 * halo), f32))

    kernel = functools.partial(
        _bn_relu_conv_kernel, ksize=k, width=wd, hw=hw,
        has_skip=skip_nchw is not None)

    out = pl.pallas_call(
        kernel,
        out_shape=jax.ShapeDtypeStruct((n, c_out, hw), x_nchw.dtype),
        grid_spec=pltpu.PrefetchScalarGridSpec(
            num_scalar_prefetch=0,
            grid=(n,),
            in_specs=in_specs,
            out_specs=pl.BlockSpec((1, c_out, hw), lambda i: (i, 0, 0)),
            scratch_shapes=scratch_shapes,
        ),
        compiler_params=pltpu.CompilerParams(
            dimension_semantics=("parallel",),
            vmem_limit_bytes=64 * 1024 * 1024,
        ),
    )(*inputs)
    return out.reshape(n, c_out, h, wd)


# ---------------------------------------------------------------------------
# Bilinear resize (align_corners=False, PyTorch semantics) — plain JAX glue.
# TODO(synk): bilinear resize left to XLA (static-index gather+lerp); fusing it
# into the kernel needs lane-gather/interleave support, not worth it here.
# ---------------------------------------------------------------------------
def _bilinear_resize_nchw(x, out_h, out_w):
    n, c, in_h, in_w = x.shape
    if (in_h, in_w) == (out_h, out_w):
        return x

    def src_index(out_size, in_size):
        scale = in_size / out_size
        s = (jnp.arange(out_size, dtype=jnp.float32) + 0.5) * scale - 0.5
        s = jnp.maximum(s, 0.0)                 # PyTorch clamps negative sources
        i0f = jnp.floor(s)
        frac = s - i0f
        i0 = jnp.minimum(i0f.astype(jnp.int32), in_size - 1)
        i1 = jnp.minimum(i0 + 1, in_size - 1)
        return i0, i1, frac

    h0, h1, fh = src_index(out_h, in_h)
    w0, w1, fw = src_index(out_w, in_w)
    top = jnp.take(x, h0, axis=2)
    bot = jnp.take(x, h1, axis=2)
    fh = fh[None, None, :, None]
    rows = top * (1.0 - fh) + bot * fh          # (n, c, out_h, in_w)
    left = jnp.take(rows, w0, axis=3)
    right = jnp.take(rows, w1, axis=3)
    fw = fw[None, None, None, :]
    return left * (1.0 - fw) + right * fw


# ---------------------------------------------------------------------------
# _Upsample: params + forward
# ---------------------------------------------------------------------------
def _make_bn_relu_conv_params(key, c_in, c_out, k):
    kg, kb, km, kv, kw, kbias = jax.random.split(key, 6)
    return dict(
        gamma=1.0 + 0.1 * jax.random.normal(kg, (c_in,), jnp.float32),
        beta=0.1 * jax.random.normal(kb, (c_in,), jnp.float32),
        mean=0.1 * jax.random.normal(km, (c_in,), jnp.float32),   # running stats
        var=jax.random.uniform(kv, (c_in,), jnp.float32, minval=0.5, maxval=1.5),
        w=0.1 * jax.random.normal(kw, (c_out, c_in, k, k), jnp.float32),
        b=0.01 * jax.random.normal(kbias, (c_out,), jnp.float32),
    )


def make_upsample_params(key, num_maps_in, num_maps_out, num_classes, use_aux=False):
    k_blend, k_aux = jax.random.split(key)
    params = {"blend_conv": _make_bn_relu_conv_params(k_blend, num_maps_in, num_maps_out, 3)}
    if use_aux:
        params["logits_aux"] = _make_bn_relu_conv_params(k_aux, num_maps_in, num_classes, 1)
    return params


def upsample_forward(params, x_, skip, *, use_aux=False, eps=1e-5):
    """_Upsample.forward: resize x_ to skip's size, add skip, blend conv (+aux)."""
    out_h, out_w = skip.shape[2], skip.shape[3]
    x = _bilinear_resize_nchw(x_, out_h, out_w)
    # `x + skip` is fused into the Pallas BN+ReLU+3x3-conv kernel.
    x = bn_relu_conv(x, params["blend_conv"], skip_nchw=skip, eps=eps)
    if use_aux:
        aux = bn_relu_conv(x_, params["logits_aux"], eps=eps)   # k=1, no skip
        return x, aux
    return x, None


# ---------------------------------------------------------------------------
# Pure-JAX reference (for correctness cross-check)
# ---------------------------------------------------------------------------
def _bn_relu_conv_reference(x, p, eps=1e-5):
    inv = 1.0 / jnp.sqrt(p["var"] + eps)
    xn = (x - p["mean"][None, :, None, None]) * inv[None, :, None, None]
    xn = xn * p["gamma"][None, :, None, None] + p["beta"][None, :, None, None]
    a = jnp.maximum(xn, 0.0)
    k = p["w"].shape[2]
    pad = k // 2
    y = jax.lax.conv_general_dilated(
        a, p["w"], window_strides=(1, 1),
        padding=((pad, pad), (pad, pad)),
        dimension_numbers=("NCHW", "OIHW", "NCHW"),
        precision=jax.lax.Precision.HIGHEST)
    return y + p["b"][None, :, None, None]


def upsample_forward_reference(params, x_, skip, *, use_aux=False, eps=1e-5):
    x = _bilinear_resize_nchw(x_, skip.shape[2], skip.shape[3])
    x = x + skip
    out = _bn_relu_conv_reference(x, params["blend_conv"], eps=eps)
    aux = _bn_relu_conv_reference(x_, params["logits_aux"], eps=eps) if use_aux else None
    return out, aux


if __name__ == "__main__":
    key = jax.random.PRNGKey(0)
    kx, ks, kp = jax.random.split(key, 3)

    # Small shapes: x_ is the low-res feature map, skip the higher-res one.
    n, c_in = 2, 4
    num_maps_out, num_classes = 8, 3
    x_ = jax.random.normal(kx, (n, c_in, 8, 8), jnp.float32)
    skip = jax.random.normal(ks, (n, c_in, 16, 16), jnp.float32)

    use_aux = True  # exercise both the 3x3 blend kernel and the 1x1 aux kernel
    params = make_upsample_params(kp, c_in, num_maps_out, num_classes, use_aux=use_aux)

    fwd = jax.jit(functools.partial(upsample_forward, use_aux=use_aux))
    out, aux = fwd(params, x_, skip)
    out = jax.block_until_ready(out)
    aux = jax.block_until_ready(aux)

    # Shapes follow PyTorch semantics.
    assert out.shape == (n, num_maps_out, 16, 16)
    assert aux.shape == (n, num_classes, 8, 8)

    # Cross-check the fused Pallas kernels against a pure-JAX reference.
    ref_out, ref_aux = upsample_forward_reference(params, x_, skip, use_aux=use_aux)
    assert jnp.allclose(out, ref_out, atol=2e-2, rtol=2e-2), \
        float(jnp.max(jnp.abs(out - ref_out)))
    assert jnp.allclose(aux, ref_aux, atol=2e-2, rtol=2e-2), \
        float(jnp.max(jnp.abs(aux - ref_aux)))

    print("KERNEL_OK")
</pallas_src>

<mosaic_0001>
module attributes {stable_mosaic.version = 11 : i64} {
  func.func @_bn_relu_conv_kernel(%arg0: i32, %arg1: memref<1x4x256xf32, #tpu.memory_space<vmem>>, %arg2: memref<1x4x256xf32, #tpu.memory_space<vmem>>, %arg3: memref<1x256xi32, #tpu.memory_space<vmem>>, %arg4: memref<4x1xf32, #tpu.memory_space<vmem>>, %arg5: memref<4x1xf32, #tpu.memory_space<vmem>>, %arg6: memref<9x8x4xf32, #tpu.memory_space<vmem>>, %arg7: memref<8x1xf32, #tpu.memory_space<vmem>>, %arg8: memref<1x8x256xf32, #tpu.memory_space<vmem>>, %arg9: memref<4x290xf32, #tpu.memory_space<vmem>>) attributes {dimension_semantics = [#tpu.dimension_semantics<parallel>], iteration_bounds = array<i64: 2>, scalar_prefetch = 0 : i64, scratch_operands = 1 : i64, tpu.core_type = #tpu.core_type<tc>, window_params = [{transform_indices = @transform_0, window_bounds = array<i64: 1, 4, 256>}, {transform_indices = @transform_1, window_bounds = array<i64: 1, 4, 256>}, {pipeline_mode = #tpu.pipeline_mode<synchronous>, transform_indices = @transform_2, window_bounds = array<i64: 1, 256>}, {pipeline_mode = #tpu.pipeline_mode<synchronous>, transform_indices = @transform_3, window_bounds = array<i64: 4, 1>}, {pipeline_mode = #tpu.pipeline_mode<synchronous>, transform_indices = @transform_4, window_bounds = array<i64: 4, 1>}, {pipeline_mode = #tpu.pipeline_mode<synchronous>, transform_indices = @transform_5, window_bounds = array<i64: 9, 8, 4>}, {pipeline_mode = #tpu.pipeline_mode<synchronous>, transform_indices = @transform_6, window_bounds = array<i64: 8, 1>}, {transform_indices = @transform_7, window_bounds = array<i64: 1, 8, 256>}]} {
    %c0 = arith.constant 0 : index
    %c0_0 = arith.constant 0 : index
    %c0_1 = arith.constant 0 : index
    %0 = vector.load %arg1[%c0, %c0_0, %c0_1] : memref<1x4x256xf32, #tpu.memory_space<vmem>>, vector<1x4x256xf32>
    %1 = vector.shape_cast %0 : vector<1x4x256xf32> to vector<4x256xf32>
    %c0_2 = arith.constant 0 : index
    %c0_3 = arith.constant 0 : index
    %c0_4 = arith.constant 0 : index
    %2 = vector.load %arg2[%c0_2, %c0_3, %c0_4] : memref<1x4x256xf32, #tpu.memory_space<vmem>>, vector<1x4x256xf32>
    %3 = vector.shape_cast %2 : vector<1x4x256xf32> to vector<4x256xf32>
    %4 = arith.addf %1, %3 : vector<4x256xf32>
    %c0_5 = arith.constant 0 : index
    %c0_6 = arith.constant 0 : index
    %5 = vector.load %arg4[%c0_5, %c0_6] : memref<4x1xf32, #tpu.memory_space<vmem>>, vector<4x1xf32>
    %6 = vector.broadcast %5 : vector<4x1xf32> to vector<4x256xf32>
    %7 = arith.mulf %4, %6 : vector<4x256xf32>
    %c0_7 = arith.constant 0 : index
    %c0_8 = arith.constant 0 : index
    %8 = vector.load %arg5[%c0_7, %c0_8] : memref<4x1xf32, #tpu.memory_space<vmem>>, vector<4x1xf32>
    %9 = vector.broadcast %8 : vector<4x1xf32> to vector<4x256xf32>
    %10 = arith.addf %7, %9 : vector<4x256xf32>
    %cst = arith.constant 0.000000e+00 : f32
    %11 = vector.broadcast %cst : f32 to vector<4x256xf32>
    %12 = arith.maximumf %10, %11 : vector<4x256xf32>
    %c0_9 = arith.constant 0 : index
    %c0_10 = arith.constant 0 : index
    %13 = vector.load %arg7[%c0_9, %c0_10] : memref<8x1xf32, #tpu.memory_space<vmem>>, vector<8x1xf32>
    %14 = vector.shape_cast %13 : vector<8x1xf32> to vector<8x1xf32>
    %15 = vector.broadcast %14 : vector<8x1xf32> to vector<8x256xf32>
    %cst_11 = arith.constant 0.000000e+00 : f32
    %16 = vector.broadcast %cst_11 : f32 to vector<4x17xf32>
    %c0_12 = arith.constant 0 : index
    %c0_13 = arith.constant 0 : index
    %17 = vector.load %arg9[%c0_12, %c0_13] : memref<4x290xf32, #tpu.memory_space<vmem>>, vector<4x17xf32>
    tpu.vector_store %arg9[%c0_12, %c0_13], %16 {strides = array<i32>} : memref<4x290xf32, #tpu.memory_space<vmem>>, vector<4x17xf32>,
    %c0_14 = arith.constant 0 : index
    %c273 = arith.constant 273 : index
    %18 = vector.load %arg9[%c0_14, %c273] : memref<4x290xf32, #tpu.memory_space<vmem>>, vector<4x17xf32>
    tpu.vector_store %arg9[%c0_14, %c273], %16 {strides = array<i32>} : memref<4x290xf32, #tpu.memory_space<vmem>>, vector<4x17xf32>,
    %c0_15 = arith.constant 0 : index
    %c17 = arith.constant 17 : index
    %19 = vector.load %arg9[%c0_15, %c17] : memref<4x290xf32, #tpu.memory_space<vmem>>, vector<4x256xf32>
    tpu.vector_store %arg9[%c0_15, %c17], %12 {strides = array<i32>} : memref<4x290xf32, #tpu.memory_space<vmem>>, vector<4x256xf32>,
    %c0_16 = arith.constant 0 : index
    %c0_17 = arith.constant 0 : index
    %20 = vector.load %arg3[%c0_16, %c0_17] : memref<1x256xi32, #tpu.memory_space<vmem>>, vector<1x256xi32>
    %c0_18 = arith.constant 0 : index
    %c0_19 = arith.constant 0 : index
    %21 = vector.load %arg9[%c0_18, %c0_19] : memref<4x290xf32, #tpu.memory_space<vmem>>, vector<4x256xf32>
    %c1_i32 = arith.constant 1 : i32
    %22 = vector.broadcast %c1_i32 : i32 to vector<1x256xi32>
    %23 = arith.cmpi sge, %20, %22 : vector<1x256xi32>
    %cst_20 = arith.constant 0.000000e+00 : f32
    %24 = vector.shape_cast %23 : vector<1x256xi1> to vector<1x256xi1>
    %25 = vector.broadcast %24 : vector<1x256xi1> to vector<4x256xi1>
    %26 = vector.broadcast %cst_20 : f32 to vector<4x256xf32>
    %27 = arith.select %25, %21, %26 : vector<4x256xi1>, vector<4x256xf32>
    %c0_21 = arith.constant 0 : index
    %c0_22 = arith.constant 0 : index
    %c0_23 = arith.constant 0 : index
    %28 = vector.load %arg6[%c0_21, %c0_22, %c0_23] : memref<9x8x4xf32, #tpu.memory_space<vmem>>, vector<1x8x4xf32>
    %29 = vector.shape_cast %28 : vector<1x8x4xf32> to vector<8x4xf32>
    %cst_24 = arith.constant dense<0.000000e+00> : vector<8x256xf32>
    %30 = tpu.matmul %29, %27, %cst_24 {dimension_numbers = #tpu.dot_dimension_numbers<[1], [0], [0], [1], [0, 0, 1, 1], [], []>} : vector<8x4xf32>, vector<4x256xf32>, vector<8x256xf32> -> vector<8x256xf32>
    %31 = arith.addf %15, %30 : vector<8x256xf32>
    %c0_25 = arith.constant 0 : index
    %c1 = arith.constant 1 : index
    %32 = vector.load %arg9[%c0_25, %c1] : memref<4x290xf32, #tpu.memory_space<vmem>>, vector<4x256xf32>
    %c1_26 = arith.constant 1 : index
    %c0_27 = arith.constant 0 : index
    %c0_28 = arith.constant 0 : index
    %33 = vector.load %arg6[%c1_26, %c0_27, %c0_28] : memref<9x8x4xf32, #tpu.memory_space<vmem>>, vector<1x8x4xf32>
    %34 = vector.shape_cast %33 : vector<1x8x4xf32> to vector<8x4xf32>
    %cst_29 = arith.constant dense<0.000000e+00> : vector<8x256xf32>
    %35 = tpu.matmul %34, %32, %cst_29 {dimension_numbers = #tpu.dot_dimension_numbers<[1], [0], [0], [1], [0, 0, 1, 1], [], []>} : vector<8x4xf32>, vector<4x256xf32>, vector<8x256xf32> -> vector<8x256xf32>
    %36 = arith.addf %31, %35 : vector<8x256xf32>
    %c0_30 = arith.constant 0 : index
    %c2 = arith.constant 2 : index
    %37 = vector.load %arg9[%c0_30, %c2] : memref<4x290xf32, #tpu.memory_space<vmem>>, vector<4x256xf32>
    %c15_i32 = arith.constant 15 : i32
    %38 = vector.broadcast %c15_i32 : i32 to vector<1x256xi32>
    %39 = arith.cmpi slt, %20, %38 : vector<1x256xi32>
    %cst_31 = arith.constant 0.000000e+00 : f32
    %40 = vector.shape_cast %39 : vector<1x256xi1> to vector<1x256xi1>
    %41 = vector.broadcast %40 : vector<1x256xi1> to vector<4x256xi1>
    %42 = vector.broadcast %cst_31 : f32 to vector<4x256xf32>
    %43 = arith.select %41, %37, %42 : vector<4x256xi1>, vector<4x256xf32>
    %c2_32 = arith.constant 2 : index
    %c0_33 = arith.constant 0 : index
    %c0_34 = arith.constant 0 : index
    %44 = vector.load %arg6[%c2_32, %c0_33, %c0_34] : memref<9x8x4xf32, #tpu.memory_space<vmem>>, vector<1x8x4xf32>
    %45 = vector.shape_cast %44 : vector<1x8x4xf32> to vector<8x4xf32>
    %cst_35 = arith.constant dense<0.000000e+00> : vector<8x256xf32>
    %46 = tpu.matmul %45, %43, %cst_35 {dimension_numbers = #tpu.dot_dimension_numbers<[1], [0], [0], [1], [0, 0, 1, 1], [], []>} : vector<8x4xf32>, vector<4x256xf32>, vector<8x256xf32> -> vector<8x256xf32>
    %47 = arith.addf %36, %46 : vector<8x256xf32>
    %c0_36 = arith.constant 0 : index
    %c16 = arith.constant 16 : index
    %48 = vector.load %arg9[%c0_36, %c16] : memref<4x290xf32, #tpu.memory_space<vmem>>, vector<4x256xf32>
    %c1_i32_37 = arith.constant 1 : i32
    %49 = vector.broadcast %c1_i32_37 : i32 to vector<1x256xi32>
    %50 = arith.cmpi sge, %20, %49 : vector<1x256xi32>
    %cst_38 = arith.constant 0.000000e+00 : f32
    %51 = vector.shape_cast %50 : vector<1x256xi1> to vector<1x256xi1>
    %52 = vector.broadcast %51 : vector<1x256xi1> to vector<4x256xi1>
    %53 = vector.broadcast %cst_38 : f32 to vector<4x256xf32>
    %54 = arith.select %52, %48, %53 : vector<4x256xi1>, vector<4x256xf32>
    %c3 = arith.constant 3 : index
    %c0_39 = arith.constant 0 : index
    %c0_40 = arith.constant 0 : index
    %55 = vector.load %arg6[%c3, %c0_39, %c0_40] : memref<9x8x4xf32, #tpu.memory_space<vmem>>, vector<1x8x4xf32>
    %56 = vector.shape_cast %55 : vector<1x8x4xf32> to vector<8x4xf32>
    %cst_41 = arith.constant dense<0.000000e+00> : vector<8x256xf32>
    %57 = tpu.matmul %56, %54, %cst_41 {dimension_numbers = #tpu.dot_dimension_numbers<[1], [0], [0], [1], [0, 0, 1, 1], [], []>} : vector<8x4xf32>, vector<4x256xf32>, vector<8x256xf32> -> vector<8x256xf32>
    %58 = arith.addf %47, %57 : vector<8x256xf32>
    %c0_42 = arith.constant 0 : index
    %c17_43 = arith.constant 17 : index
    %59 = vector.load %arg9[%c0_42, %c17_43] : memref<4x290xf32, #tpu.memory_space<vmem>>, vector<4x256xf32>
    %c4 = arith.constant 4 : index
    %c0_44 = arith.constant 0 : index
    %c0_45 = arith.constant 0 : index
    %60 = vector.load %arg6[%c4, %c0_44, %c0_45] : memref<9x8x4xf32, #tpu.memory_space<vmem>>, vector<1x8x4xf32>
    %61 = vector.shape_cast %60 : vector<1x8x4xf32> to vector<8x4xf32>
    %cst_46 = arith.constant dense<0.000000e+00> : vector<8x256xf32>
    %62 = tpu.matmul %61, %59, %cst_46 {dimension_numbers = #tpu.dot_dimension_numbers<[1], [0], [0], [1], [0, 0, 1, 1], [], []>} : vector<8x4xf32>, vector<4x256xf32>, vector<8x256xf32> -> vector<8x256xf32>
    %63 = arith.addf %58, %62 : vector<8x256xf32>
    %c0_47 = arith.constant 0 : index
    %c18 = arith.constant 18 : index
    %64 = vector.load %arg9[%c0_47, %c18] : memref<4x290xf32, #tpu.memory_space<vmem>>, vector<4x256xf32>
    %c15_i32_48 = arith.constant 15 : i32
    %65 = vector.broadcast %c15_i32_48 : i32 to vector<1x256xi32>
    %66 = arith.cmpi slt, %20, %65 : vector<1x256xi32>
    %cst_49 = arith.constant 0.000000e+00 : f32
    %67 = vector.shape_cast %66 : vector<1x256xi1> to vector<1x256xi1>
    %68 = vector.broadcast %67 : vector<1x256xi1> to vector<4x256xi1>
    %69 = vector.broadcast %cst_49 : f32 to vector<4x256xf32>
    %70 = arith.select %68, %64, %69 : vector<4x256xi1>, vector<4x256xf32>
    %c5 = arith.constant 5 : index
    %c0_50 = arith.constant 0 : index
    %c0_51 = arith.constant 0 : index
    %71 = vector.load %arg6[%c5, %c0_50, %c0_51] : memref<9x8x4xf32, #tpu.memory_space<vmem>>, vector<1x8x4xf32>
    %72 = vector.shape_cast %71 : vector<1x8x4xf32> to vector<8x4xf32>
    %cst_52 = arith.constant dense<0.000000e+00> : vector<8x256xf32>
    %73 = tpu.matmul %72, %70, %cst_52 {dimension_numbers = #tpu.dot_dimension_numbers<[1], [0], [0], [1], [0, 0, 1, 1], [], []>} : vector<8x4xf32>, vector<4x256xf32>, vector<8x256xf32> -> vector<8x256xf32>
    %74 = arith.addf %63, %73 : vector<8x256xf32>
    %c0_53 = arith.constant 0 : index
    %c32 = arith.constant 32 : index
    %75 = vector.load %arg9[%c0_53, %c32] : memref<4x290xf32, #tpu.memory_space<vmem>>, vector<4x256xf32>
    %c1_i32_54 = arith.constant 1 : i32
    %76 = vector.broadcast %c1_i32_54 : i32 to vector<1x256xi32>
    %77 = arith.cmpi sge, %20, %76 : vector<1x256xi32>
    %cst_55 = arith.constant 0.000000e+00 : f32
    %78 = vector.shape_cast %77 : vector<1x256xi1> to vector<1x256xi1>
    %79 = vector.broadcast %78 : vector<1x256xi1> to vector<4x256xi1>
    %80 = vector.broadcast %cst_55 : f32 to vector<4x256xf32>
    %81 = arith.select %79, %75, %80 : vector<4x256xi1>, vector<4x256xf32>
    %c6 = arith.constant 6 : index
    %c0_56 = arith.constant 0 : index
    %c0_57 = arith.constant 0 : index
    %82 = vector.load %arg6[%c6, %c0_56, %c0_57] : memref<9x8x4xf32, #tpu.memory_space<vmem>>, vector<1x8x4xf32>
    %83 = vector.shape_cast %82 : vector<1x8x4xf32> to vector<8x4xf32>
    %cst_58 = arith.constant dense<0.000000e+00> : vector<8x256xf32>
    %84 = tpu.matmul %83, %81, %cst_58 {dimension_numbers = #tpu.dot_dimension_numbers<[1], [0], [0], [1], [0, 0, 1, 1], [], []>} : vector<8x4xf32>, vector<4x256xf32>, vector<8x256xf32> -> vector<8x256xf32>
    %85 = arith.addf %74, %84 : vector<8x256xf32>
    %c0_59 = arith.constant 0 : index
    %c33 = arith.constant 33 : index
    %86 = vector.load %arg9[%c0_59, %c33] : memref<4x290xf32, #tpu.memory_space<vmem>>, vector<4x256xf32>
    %c7 = arith.constant 7 : index
    %c0_60 = arith.constant 0 : index
    %c0_61 = arith.constant 0 : index
    %87 = vector.load %arg6[%c7, %c0_60, %c0_61] : memref<9x8x4xf32, #tpu.memory_space<vmem>>, vector<1x8x4xf32>
    %88 = vector.shape_cast %87 : vector<1x8x4xf32> to vector<8x4xf32>
    %cst_62 = arith.constant dense<0.000000e+00> : vector<8x256xf32>
    %89 = tpu.matmul %88, %86, %cst_62 {dimension_numbers = #tpu.dot_dimension_numbers<[1], [0], [0], [1], [0, 0, 1, 1], [], []>} : vector<8x4xf32>, vector<4x256xf32>, vector<8x256xf32> -> vector<8x256xf32>
    %90 = arith.addf %85, %89 : vector<8x256xf32>
    %c0_63 = arith.constant 0 : index
    %c34 = arith.constant 34 : index
    %91 = vector.load %arg9[%c0_63, %c34] : memref<4x290xf32, #tpu.memory_space<vmem>>, vector<4x256xf32>
    %c15_i32_64 = arith.constant 15 : i32
    %92 = vector.broadcast %c15_i32_64 : i32 to vector<1x256xi32>
    %93 = arith.cmpi slt, %20, %92 : vector<1x256xi32>
    %cst_65 = arith.constant 0.000000e+00 : f32
    %94 = vector.shape_cast %93 : vector<1x256xi1> to vector<1x256xi1>
    %95 = vector.broadcast %94 : vector<1x256xi1> to vector<4x256xi1>
    %96 = vector.broadcast %cst_65 : f32 to vector<4x256xf32>
    %97 = arith.select %95, %91, %96 : vector<4x256xi1>, vector<4x256xf32>
    %c8 = arith.constant 8 : index
    %c0_66 = arith.constant 0 : index
    %c0_67 = arith.constant 0 : index
    %98 = vector.load %arg6[%c8, %c0_66, %c0_67] : memref<9x8x4xf32, #tpu.memory_space<vmem>>, vector<1x8x4xf32>
    %99 = vector.shape_cast %98 : vector<1x8x4xf32> to vector<8x4xf32>
    %cst_68 = arith.constant dense<0.000000e+00> : vector<8x256xf32>
    %100 = tpu.matmul %99, %97, %cst_68 {dimension_numbers = #tpu.dot_dimension_numbers<[1], [0], [0], [1], [0, 0, 1, 1], [], []>} : vector<8x4xf32>, vector<4x256xf32>, vector<8x256xf32> -> vector<8x256xf32>
    %101 = arith.addf %90, %100 : vector<8x256xf32>
    %c0_69 = arith.constant 0 : index
    %c0_70 = arith.constant 0 : index
    %c0_71 = arith.constant 0 : index
    %102 = vector.load %arg8[%c0_69, %c0_70, %c0_71] : memref<1x8x256xf32, #tpu.memory_space<vmem>>, vector<1x8x256xf32>
    %103 = vector.shape_cast %102 : vector<1x8x256xf32> to vector<8x256xf32>
    %104 = vector.shape_cast %101 : vector<8x256xf32> to vector<1x8x256xf32>
    tpu.vector_store %arg8[%c0_69, %c0_70, %c0_71], %104 {strides = array<i32>} : memref<1x8x256xf32, #tpu.memory_space<vmem>>, vector<1x8x256xf32>,
    return
  }
  func.func @transform_0(%arg0: i32) -> (i32, i32, i32) {
    %c0_i32 = arith.constant 0 : i32
    %c0_i32_0 = arith.constant 0 : i32
    %c0_i32_1 = arith.constant 0 : i32
    return %arg0, %c0_i32, %c0_i32_0 : i32, i32, i32
  }
  func.func @transform_1(%arg0: i32) -> (i32, i32, i32) {
    %c0_i32 = arith.constant 0 : i32
    %c0_i32_0 = arith.constant 0 : i32
    %c0_i32_1 = arith.constant 0 : i32
    return %arg0, %c0_i32, %c0_i32_0 : i32, i32, i32
  }
  func.func @transform_2(%arg0: i32) -> (i32, i32) {
    %c0_i32 = arith.constant 0 : i32
    %c0_i32_0 = arith.constant 0 : i32
    %c0_i32_1 = arith.constant 0 : i32
    return %c0_i32, %c0_i32_0 : i32, i32
  }
  func.func @transform_3(%arg0: i32) -> (i32, i32) {
    %c0_i32 = arith.constant 0 : i32
    %c0_i32_0 = arith.constant 0 : i32
    %c0_i32_1 = arith.constant 0 : i32
    return %c0_i32, %c0_i32_0 : i32, i32
  }
  func.func @transform_4(%arg0: i32) -> (i32, i32) {
    %c0_i32 = arith.constant 0 : i32
    %c0_i32_0 = arith.constant 0 : i32
    %c0_i32_1 = arith.constant 0 : i32
    return %c0_i32, %c0_i32_0 : i32, i32
  }
  func.func @transform_5(%arg0: i32) -> (i32, i32, i32) {
    %c0_i32 = arith.constant 0 : i32
    %c0_i32_0 = arith.constant 0 : i32
    %c0_i32_1 = arith.constant 0 : i32
    %c0_i32_2 = arith.constant 0 : i32
    return %c0_i32, %c0_i32_0, %c0_i32_1 : i32, i32, i32
  }
  func.func @transform_6(%arg0: i32) -> (i32, i32) {
    %c0_i32 = arith.constant 0 : i32
    %c0_i32_0 = arith.constant 0 : i32
    %c0_i32_1 = arith.constant 0 : i32
    return %c0_i32, %c0_i32_0 : i32, i32
  }
  func.func @transform_7(%arg0: i32) -> (i32, i32, i32) {
    %c0_i32 = arith.constant 0 : i32
    %c0_i32_0 = arith.constant 0 : i32
    %c0_i32_1 = arith.constant 0 : i32
    return %arg0, %c0_i32, %c0_i32_0 : i32, i32, i32
  }
}

module attributes {stable_mosaic.version = 11 : i64} {
  func.func @_bn_relu_conv_kernel(%arg0: i32, %arg1: memref<1x4x64xf32, #tpu.memory_space<vmem>>, %arg2: memref<4x1xf32, #tpu.memory_space<vmem>>, %arg3: memref<4x1xf32, #tpu.memory_space<vmem>>, %arg4: memref<1x3x4xf32, #tpu.memory_space<vmem>>, %arg5: memref<3x1xf32, #tpu.memory_space<vmem>>, %arg6: memref<1x3x64xf32, #tpu.memory_space<vmem>>) attributes {dimension_semantics = [#tpu.dimension_semantics<parallel>], iteration_bounds = array<i64: 2>, scalar_prefetch = 0 : i64, scratch_operands = 0 : i64, tpu.core_type = #tpu.core_type<tc>, window_params = [{transform_indices = @transform_0, window_bounds = array<i64: 1, 4, 64>}, {pipeline_mode = #tpu.pipeline_mode<synchronous>, transform_indices = @transform_1, window_bounds = array<i64: 4, 1>}, {pipeline_mode = #tpu.pipeline_mode<synchronous>, transform_indices = @transform_2, window_bounds = array<i64: 4, 1>}, {pipeline_mode = #tpu.pipeline_mode<synchronous>, transform_indices = @transform_3, window_bounds = array<i64: 1, 3, 4>}, {pipeline_mode = #tpu.pipeline_mode<synchronous>, transform_indices = @transform_4, window_bounds = array<i64: 3, 1>}, {transform_indices = @transform_5, window_bounds = array<i64: 1, 3, 64>}]} {
    %c0 = arith.constant 0 : index
    %c0_0 = arith.constant 0 : index
    %c0_1 = arith.constant 0 : index
    %0 = vector.load %arg1[%c0, %c0_0, %c0_1] : memref<1x4x64xf32, #tpu.memory_space<vmem>>, vector<1x4x64xf32>
    %1 = vector.shape_cast %0 : vector<1x4x64xf32> to vector<4x64xf32>
    %c0_2 = arith.constant 0 : index
    %c0_3 = arith.constant 0 : index
    %2 = vector.load %arg2[%c0_2, %c0_3] : memref<4x1xf32, #tpu.memory_space<vmem>>, vector<4x1xf32>
    %3 = vector.broadcast %2 : vector<4x1xf32> to vector<4x64xf32>
    %4 = arith.mulf %1, %3 : vector<4x64xf32>
    %c0_4 = arith.constant 0 : index
    %c0_5 = arith.constant 0 : index
    %5 = vector.load %arg3[%c0_4, %c0_5] : memref<4x1xf32, #tpu.memory_space<vmem>>, vector<4x1xf32>
    %6 = vector.broadcast %5 : vector<4x1xf32> to vector<4x64xf32>
    %7 = arith.addf %4, %6 : vector<4x64xf32>
    %cst = arith.constant 0.000000e+00 : f32
    %8 = vector.broadcast %cst : f32 to vector<4x64xf32>
    %9 = arith.maximumf %7, %8 : vector<4x64xf32>
    %c0_6 = arith.constant 0 : index
    %c0_7 = arith.constant 0 : index
    %10 = vector.load %arg5[%c0_6, %c0_7] : memref<3x1xf32, #tpu.memory_space<vmem>>, vector<3x1xf32>
    %11 = vector.shape_cast %10 : vector<3x1xf32> to vector<3x1xf32>
    %12 = vector.broadcast %11 : vector<3x1xf32> to vector<3x64xf32>
    %c0_8 = arith.constant 0 : index
    %c0_9 = arith.constant 0 : index
    %c0_10 = arith.constant 0 : index
    %13 = vector.load %arg4[%c0_8, %c0_9, %c0_10] : memref<1x3x4xf32, #tpu.memory_space<vmem>>, vector<1x3x4xf32>
    %14 = vector.shape_cast %13 : vector<1x3x4xf32> to vector<3x4xf32>
    %cst_11 = arith.constant dense<0.000000e+00> : vector<3x64xf32>
    %15 = tpu.matmul %14, %9, %cst_11 {dimension_numbers = #tpu.dot_dimension_numbers<[1], [0], [0], [1], [0, 0, 1, 1], [], []>} : vector<3x4xf32>, vector<4x64xf32>, vector<3x64xf32> -> vector<3x64xf32>
    %16 = arith.addf %12, %15 : vector<3x64xf32>
    %c0_12 = arith.constant 0 : index
    %c0_13 = arith.constant 0 : index
    %c0_14 = arith.constant 0 : index
    %17 = vector.load %arg6[%c0_12, %c0_13, %c0_14] : memref<1x3x64xf32, #tpu.memory_space<vmem>>, vector<1x3x64xf32>
    %18 = vector.shape_cast %17 : vector<1x3x64xf32> to vector<3x64xf32>
    %19 = vector.shape_cast %16 : vector<3x64xf32> to vector<1x3x64xf32>
    tpu.vector_store %arg6[%c0_12, %c0_13, %c0_14], %19 {strides = array<i32>} : memref<1x3x64xf32, #tpu.memory_space<vmem>>, vector<1x3x64xf32>,
    return
  }
  func.func @transform_0(%arg0: i32) -> (i32, i32, i32) {
    %c0_i32 = arith.constant 0 : i32
    %c0_i32_0 = arith.constant 0 : i32
    %c0_i32_1 = arith.constant 0 : i32
    return %arg0, %c0_i32, %c0_i32_0 : i32, i32, i32
  }
  func.func @transform_1(%arg0: i32) -> (i32, i32) {
    %c0_i32 = arith.constant 0 : i32
    %c0_i32_0 = arith.constant 0 : i32
    %c0_i32_1 = arith.constant 0 : i32
    return %c0_i32, %c0_i32_0 : i32, i32
  }
  func.func @transform_2(%arg0: i32) -> (i32, i32) {
    %c0_i32 = arith.constant 0 : i32
    %c0_i32_0 = arith.constant 0 : i32
    %c0_i32_1 = arith.constant 0 : i32
    return %c0_i32, %c0_i32_0 : i32, i32
  }
  func.func @transform_3(%arg0: i32) -> (i32, i32, i32) {
    %c0_i32 = arith.constant 0 : i32
    %c0_i32_0 = arith.constant 0 : i32
    %c0_i32_1 = arith.constant 0 : i32
    %c0_i32_2 = arith.constant 0 : i32
    return %c0_i32, %c0_i32_0, %c0_i32_1 : i32, i32, i32
  }
  func.func @transform_4(%arg0: i32) -> (i32, i32) {
    %c0_i32 = arith.constant 0 : i32
    %c0_i32_0 = arith.constant 0 : i32
    %c0_i32_1 = arith.constant 0 : i32
    return %c0_i32, %c0_i32_0 : i32, i32
  }
  func.func @transform_5(%arg0: i32) -> (i32, i32, i32) {
    %c0_i32 = arith.constant 0 : i32
    %c0_i32_0 = arith.constant 0 : i32
    %c0_i32_1 = arith.constant 0 : i32
    return %arg0, %c0_i32, %c0_i32_0 : i32, i32, i32
  }
}

</mosaic_0001>

<bundles_post_ra>
// kernel: upsample_forward.3
= control target key start
LH: loop header
LB: loop body
LE: loop exit
PB: predicated region body
PF: predicated region fallthrough
CT: control target
= control target key end

     0   :  { %10 = vsyncpa [#allocation3], 0  ;;  %s1181_s0 = inlined_call_operand.hbm [shape: f32[2,4,64], index: 0, kind: input, shape index: {}]   ;;  %s1182_s1 = inlined_call_operand.hbm [shape: f32[4,1], index: 1, kind: input, shape index: {}]   ;;  %s1183_s2 = inlined_call_operand.hbm [shape: f32[4,1], index: 2, kind: input, shape index: {}]   ;;  %s1184_s3 = inlined_call_operand.hbm [shape: f32[1,3,4], index: 3, kind: input, shape index: {}]   ;;  %s1185_s4 = inlined_call_operand.hbm [shape: f32[3,1], index: 4, kind: input, shape index: {}]   ;;  %s1186_s5 = inlined_call_operand.hbm [shape: f32[2,3,64], index: 5, kind: output, shape index: {}]  }
   0x1   :  { %12 = vsyncpa [#allocation3 + $0x1], 0 }
   0x2   :  { %13 = vsyncpa [#allocation6], 0 }
   0x3   :  { %14 = vsyncpa [#allocation9], 0 }
   0x4   :  { %15 = vsyncpa [#allocation4], 0 }
   0x5   :  { %17 = vsyncpa [#allocation4 + $0x1], 0  ;;  %s894_s18 = smov 0   ;;  %s896_s19 = smov 0  }
   0x6   :  { %s898_s20 = smov 0   ;;  %s900_s21 = smov 0  }
   0x7 LB: > { %s855_s22 = smov [#allocation5]   ;;  %s915_s24 = sadd.s32 4294967295, %s853_s21   ;;  %s853_s21 = sphi %s900_s21, %s1210_s21   ;;  %s849_s20 = sphi %s898_s20, %s1209_s20   ;;  %s845_s19 = sphi %s896_s19, %s1208_s19   ;;  %s841_s18 = sphi %s894_s18, %s1207_s18  }
   0x8   : > { %s177_s23 = sshll.u32 %s855_s22, 4  ;;  %p517_p0 = scmp.ge.s32.totalorder %s853_s21, 1  ;;  %s920_s23 = int_to_ptr.vmem [resolvable:$true] %s177_s23 }
   0x9   : > { %p1187_p1 = scmp.eq.s32.totalorder %s915_s24, 0  ;;  %p164_p2 = scmp.lt.s32.totalorder %s853_s21, 3 }
   0xa   : > { %s856_s26 = smov [#allocation8]   ;;  %s857_s28 = smov [#allocation7]  }
   0xb   : > { %p922_p3 = pnand %p517_p0, %p164_p2  ;;  %s199_s27 = sshll.u32 %s856_s26, 4  ;;  %s929_s27 = int_to_ptr.vmem [resolvable:$true] %s199_s27 }
   0xc   : > { %s188_s29 = sshll.u32 %s857_s28, 4  ;;  %s858_s6 = smov [#allocation10]   ;;  %s937_s29 = int_to_ptr.vmem [resolvable:$true] %s188_s29 }
   0xd   : > { %s1190_s25 = scalar_select %p922_p3, 1, 0 }
   0xe   : > { %p565_p5 = pneg %p922_p3  ;;  %s939_s7 = sshll.u32 %s858_s6, 4  ;;  %s211_s7 = int_to_ptr.vmem [resolvable:$true] %s939_s7 }
   0xf   : > { %s637_s10 = scalar_lea.hbm %s1182_s1, 64 }
  0x10   : > { %p933_p6 = pnand %p565_p5, %p1187_p1  ;;  %p638_p7 = scmp.ne.s32.totalorder %s1182_s1, %s637_s10 }
  0x11   : > { %p644_p11 = scmp.lt.u32.totalorder %s637_s10, %s1182_s1 }
  0x12   : > { %p949_p8 = pneg %p933_p6 }
  0x14   : > { %p640_p9 = pnand %p949_p8, %p638_p7 }
  0x16   : > { %p641_p10 = pneg %p640_p9 }
  0x18   : > { %p646_p12 = pnand %p644_p11, %p641_p10 }
  0x1a   : > { %649 = shalt.err (!%p646_p12)
}
  0x1b   : > { %s650_s16 = scalar_lea.vmem %s920_s23, 64  ;;  %p658_p5 = scmp.lt.s32.totalorder %s920_s23, %s920_s23 }
  0x1c   : > { %p651_p13 = scmp.ne.s32.totalorder %s920_s23, %s650_s16  ;;  %p659_p4 = scmp.lt.s32.totalorder %s650_s16, %s650_s16 }
  0x1e   : > { %p653_p0 = pnand %p651_p13, %p949_p8  ;;  %p660_p7 = por %p659_p4, %p658_p5 }
  0x20   : > { %p654_p2 = pneg %p653_p0 }
  0x22   : > { %p661_p9 = pnand %p660_p7, %p654_p2 }
  0x24   : > { %664 = shalt.err (!%p661_p9)
}
  0x25   : > { %568 = dma.hbm_to_vmem [thread:$0]  (!%p933_p6), %s1182_s1, 64, %s920_s23, [#allocation6]  }
  0x26   : > { %s665_s6 = scalar_lea.hbm %s1184_s3, 64 }
  0x27   : > { %p666_p10 = scmp.ne.s32.totalorder %s1184_s3, %s665_s6  ;;  %p672_p12 = scmp.lt.u32.totalorder %s665_s6, %s1184_s3 }
  0x29   : > { %p668_p4 = pnand %p666_p10, %p949_p8 }
  0x2b   : > { %p669_p11 = pneg %p668_p4 }
  0x2d   : > { %p674_p13 = pnand %p672_p12, %p669_p11 }
  0x2f   : > { %677 = shalt.err (!%p674_p13)
}
  0x30   : > { %s678_s23 = scalar_lea.vmem %s929_s27, 64  ;;  %p686_p7 = scmp.lt.s32.totalorder %s929_s27, %s929_s27 }
  0x31   : > { %p679_p0 = scmp.ne.s32.totalorder %s929_s27, %s678_s23  ;;  %p687_p9 = scmp.lt.s32.totalorder %s678_s23, %s678_s23 }
  0x33   : > { %p681_p2 = pnand %p679_p0, %p949_p8  ;;  %p688_p10 = por %p687_p9, %p686_p7 }
  0x35   : > { %p682_p5 = pneg %p681_p2 }
  0x37   : > { %p689_p4 = pnand %p688_p10, %p682_p5 }
  0x39   : > { %692 = shalt.err (!%p689_p4)
}
  0x3a   : > { %574 = dma.hbm_to_vmem [thread:$0]  (!%p933_p6), %s1184_s3, 64, %s929_s27, [#allocation9]  }
  0x3b   : > { %s693_s17 = scalar_lea.hbm %s1183_s2, 64 }
  0x3c   : > { %p694_p11 = scmp.ne.s32.totalorder %s1183_s2, %s693_s17  ;;  %p700_p0 = scmp.lt.u32.totalorder %s693_s17, %s1183_s2 }
  0x3e   : > { %p696_p12 = pnand %p694_p11, %p949_p8 }
  0x40   : > { %p697_p13 = pneg %p696_p12 }
  0x42   : > { %p702_p2 = pnand %p700_p0, %p697_p13 }
  0x44   : > { %705 = shalt.err (!%p702_p2)
}
  0x45   : > { %s706_s27 = scalar_lea.vmem %s937_s29, 64  ;;  %p714_p10 = scmp.lt.s32.totalorder %s937_s29, %s937_s29 }
  0x46   : > { %p707_p5 = scmp.ne.s32.totalorder %s937_s29, %s706_s27  ;;  %p715_p4 = scmp.lt.s32.totalorder %s706_s27, %s706_s27 }
  0x48   : > { %p709_p7 = pnand %p707_p5, %p949_p8  ;;  %p716_p11 = por %p715_p4, %p714_p10 }
  0x4a   : > { %p710_p9 = pneg %p709_p7 }
  0x4c   : > { %p717_p12 = pnand %p716_p11, %p710_p9 }
  0x4e   : > { %720 = shalt.err (!%p717_p12)
}
  0x4f   : > { %571 = dma.hbm_to_vmem [thread:$0]  (!%p933_p6), %s1183_s2, 64, %s937_s29, [#allocation6]  }
  0x50   : > { %s721_s23 = scalar_lea.hbm %s1185_s4, 64 }
  0x51   : > { %p722_p13 = scmp.ne.s32.totalorder %s1185_s4, %s721_s23  ;;  %p728_p5 = scmp.lt.u32.totalorder %s721_s23, %s1185_s4 }
  0x53   : > { %p724_p0 = pnand %p722_p13, %p949_p8 }
  0x55   : > { %p725_p2 = pneg %p724_p0 }
  0x57   : > { %p730_p7 = pnand %p728_p5, %p725_p2 }
  0x59   : > { %733 = shalt.err (!%p730_p7)
}
  0x5a   : > { %s734_s17 = scalar_lea.vmem %s211_s7, 64  ;;  %p742_p11 = scmp.lt.s32.totalorder %s211_s7, %s211_s7 }
  0x5b   : > { %p735_p9 = scmp.ne.s32.totalorder %s211_s7, %s734_s17  ;;  %p743_p12 = scmp.lt.s32.totalorder %s734_s17, %s734_s17 }
  0x5d   : > { %p737_p10 = pnand %p735_p9, %p949_p8  ;;  %p744_p1 = por %p743_p12, %p742_p11 }
  0x5f   : > { %p738_p4 = pneg %p737_p10 }
  0x61   : > { %p745_p3 = pnand %p744_p1, %p738_p4 }
  0x63   : > { %748 = shalt.err (!%p745_p3)
}
  0x64   : > { %577 = dma.hbm_to_vmem [thread:$0]  (!%p933_p6), %s1185_s4, 64, %s211_s7, [#allocation9]  }
  0x65   : > { %s516_s13 = sadd.s32 4294967294, %s853_s21   ;;  %s1037_s30 = sadd.s32 1, %s853_s21  }
  0x66   : > { %s27_s26 = ssub.s32 %s853_s21, %s1037_s30  ;;  %s30_s28 = sadd.s32 1, %s849_s20 }
  0x67   : > { %p28_p1 = scmp.eq.s32.totalorder %s27_s26, 0  ;;  %p37_p3 = scmp.ne.s32.totalorder %s849_s20, %s845_s19 }
  0x68   : > { %p38_p8 = scmp.eq.s32.totalorder %s853_s21, 0  ;;  %p43_p13 = scmp.ne.s32.totalorder %s845_s19, %s841_s18 }
  0x69   : > { %s1048_s6 = scalar_select %p28_p1, %s849_s20, %s30_s28  }
  0x6a   : > { %p1050_p0 = por %p38_p8, %p37_p3  ;;  %p1194_p2 = scmp.eq.s32.totalorder %s915_s24, 0 }
  0x6b   : > { %p151_p5 = scmp.eq.s32.totalorder %s915_s24, 1  ;;  %p157_p7 = scmp.eq.s32.totalorder %s516_s13, 1 }
  0x6c   : > { %p1056_p6 = por %p1194_p2, %p43_p13  ;;  %p590_p9 = scmp.lt.s32.totalorder %s853_s21, 2 }
  0x6d   : > { %s221_s8 = sand.u32 1, %s849_s20   ;;  %p1063_p10 = por %p151_p5, %p37_p3 }
  0x6e   : > { %p1067_p4 = por %p157_p7, %p43_p13  ;;  %s523_s11 = sshll.u32 %s221_s8, 2 }
  0x6f   : > { %s1196_s9 = scalar_select %p1063_p10, 1, 0 }
  0x70   : > { %s1197_s10 = scalar_select %p1067_p4, 1, 0 }
  0x71   : > { %s524_s23 = sshll.u32 %s853_s21, 6  ;;  %s225_s16 = scalar_lea.vmem [#allocation2], %s523_s11 }
  0x72   : > { %s1075_s15 = scalar_lea.hbm %s1181_s0, %s524_s23  ;;  %s232_s17 = sshll.u32 %s225_s16, 4  ;;  %s1077_s17 = int_to_ptr.vmem [resolvable:$true] %s232_s17 }
  0x73   : > { %p1081_p11 = pnand %p590_p9, %p1050_p0  ;;  %s222_s22 = scalar_lea.sflag [#allocation3], %s221_s8 }
  0x74   : > { %s749_s13 = scalar_lea.hbm %s1075_s15, 64  ;;  %s754_s11 = scalar_lea.hbm %s1181_s0, 128 }
  0x75   : > { %p750_p12 = scmp.ne.s32.totalorder %s1075_s15, %s749_s13  ;;  %p751_p1 = pneg %p1081_p11 }
  0x76   : > { %p755_p13 = scmp.lt.u32.totalorder %s1075_s15, %s1181_s0  ;;  %p756_p0 = scmp.lt.u32.totalorder %s754_s11, %s749_s13 }
  0x77   : > { %p752_p3 = pnand %p751_p1, %p750_p12  ;;  %p758_p5 = scmp.lt.u32.totalorder %s749_s13, %s1075_s15 }
  0x78   : > { %p757_p2 = por %p756_p0, %p755_p13 }
  0x79   : > { %p753_p8 = pneg %p752_p3 }
  0x7a   : > { %p759_p7 = por %p758_p5, %p757_p2 }
  0x7c   : > { %p760_p9 = pnand %p759_p7, %p753_p8 }
  0x7e   : > { %763 = shalt.err (!%p760_p9)
}
  0x7f   : > { %s764_s8 = scalar_lea.vmem %s1077_s17, 64  ;;  %s859_s12 = smov [#allocation2]  }
  0x80   : > { %p765_p12 = scmp.ne.s32.totalorder %s1077_s17, %s764_s8  ;;  %s769_s14 = sshll.u32 %s859_s12, 4  ;;  %s770_s14 = int_to_ptr.vmem [resolvable:$false] %s769_s14 }
  0x81   : > { %s771_s16 = scalar_lea.vmem %s770_s14, 128  ;;  %p772_p10 = scmp.lt.s32.totalorder %s1077_s17, %s770_s14 }
  0x82   : > { %p767_p3 = pnand %p765_p12, %p751_p1  ;;  %p773_p13 = scmp.lt.s32.totalorder %s771_s16, %s764_s8 }
  0x84   : > { %p768_p4 = pneg %p767_p3  ;;  %p774_p0 = por %p773_p13, %p772_p10 }
  0x86   : > { %p775_p2 = pnand %p774_p0, %p768_p4 }
  0x88   : > { %778 = shalt.err (!%p775_p2)
}
  0x89   : > { %581 = dma.hbm_to_vmem [thread:$0]  (!%p1081_p11), %s1075_s15, 64, %s1077_s17, %s222_s22  }
  0x8a   : > { %p1199_p8 = scmp.ne.s32.totalorder %s1190_s25, 0 }
  0x8b   : > { %s1113_s13 = sand.u32 (!%p1199_p8), 1, %s845_s19  }
  0x8c   : > { %241 = sbr.rel (%p1199_p8) target bundleno = 522 (0x20a), region = 40  ;;  %s526_s26 = sshll.u32 (!%p1199_p8), %s1113_s13, 2 }
  0x8d   : > { %s244_s28 = scalar_lea.sflag (!%p1199_p8), [#allocation3], %s1113_s13  ;;  %s247_s11 = scalar_lea.vmem (!%p1199_p8), [#allocation2], %s526_s26 }
  0x93   : > { %824 = dma.done.wait (%p1056_p6), %s244_s28, 64  }
  0x94   : > { %826 = vsyncadd (%p1056_p6), %s244_s28, 4294967232  ;;  %p1200_p10 = scmp.eq.s32.totalorder %s915_s24, 0 }
  0x96   : > { %828 = dma.done.wait (%p1200_p10), [#allocation6], 128   ;;  %p1201_p4 = pmov %p1200_p10 }
  0x98   : > { %830 = vsyncadd (%p1201_p4), [#allocation6], 4294967168  ;;  %p1202_p11 = pmov %p1201_p4 }
  0x99   : > { %p1203_p1 = pmov %p1201_p4 }
  0x9a   : > { %832 = dma.done.wait (%p1202_p11), [#allocation9], 128  }
  0x9b   : > { %834 = vsyncadd (%p1203_p1), [#allocation9], 4294967168  ;;  %v860_v0 = vmov 0   ;;  %v291_v1 = vld [vmem:[#allocation5] sm:$0xf]  ;;  %v861_v3 = vmov 0.0  }
  0x9c   : > { %635 = vset.pattern.permute.xlu0 %v860_v0  ;;  %636 = vset.pattern.permute.xlu1 %v860_v0  ;;  %v298_v2 = vld [vmem:[#allocation7] sm:$0xf]  ;;  %vm862_vm0 = vmmov 0   ;;  %v306_v4 = vld [vmem:[#allocation10] sm:$0x7]  ;;  %vm317_vm1 = vcmask 1043456  }
  0x9d   : > { %294 = vperm.xlu0 %635, %v291_v1   ;;  %540 = vmatprep.subr.mxu0 %v861_v3  ;;  %v290_v6 = vld [vmem:[%s247_s11] sm:$0xf]  ;;  %v312_v11 = vld [vmem:[#allocation8] sm:$0x7]  ;;  %vm313_vm2 = vcmask 31744   ;;  %s535_s25 = sshll.u32 %s915_s24, 6 }
  0x9e   : > { %542 = vmatprep.mubr.msk.f32.mxu0 %vm862_vm0, %v861_v3  ;;  %309 = vperm.xlu1 %636, %v306_v4   ;;  %s289_s7 = scalar_lea.vmem [#allocation11], %s526_s26  ;;  %vm392_vm3 = vcmask 518144   ;;  %s1137_s22 = scalar_lea.hbm %s1186_s5, %s535_s25 }
  0x9f   : > { %s408_s15 = sshll.u32 %s289_s7, 4  ;;  %s395_s27 = scalar_lea.sflag [#allocation4], %s1113_s13  ;;  %s1139_s15 = int_to_ptr.vmem [resolvable:$true] %s408_s15 }
  0xa0   : > { %s779_s24 = scalar_lea.vmem %s1139_s15, 64  ;;  %p1204_p5 = scmp.ne.s32.totalorder %s1196_s9, 0 }
  0xa1   : > { %301 = vperm.xlu0 %635, %v298_v2   ;;  %p780_p6 = scmp.ne.s32.totalorder %s1139_s15, %s779_s24  ;;  %s863_s23 = smov [#allocation11]  }
  0xa2   : > { %s783_s8 = sshll.u32 %s863_s23, 4  ;;  %s784_s8 = int_to_ptr.vmem [resolvable:$false] %s783_s8 }
  0xa3   : > { %p781_p7 = pnand %p780_p6, %p1204_p5  ;;  %s785_s12 = scalar_lea.vmem %s784_s8, 128 }
  0xa4   : > { %p786_p12 = scmp.lt.s32.totalorder %s1139_s15, %s784_s8  ;;  %p787_p3 = scmp.lt.s32.totalorder %s785_s12, %s779_s24 }
  0xa5   : > { %p782_p9 = pneg %p781_p7 }
  0xa6   : > { %p788_p13 = por %p787_p3, %p786_p12 }
  0xa8   : > { %p789_p0 = pnand %p788_p13, %p782_p9 }
 0x11c   : > { %v295_v5 = vpop.permute.xlu0 %294 }
 0x11d   : > { %v297_v7 = vmul.f32 %v295_v5, %v290_v6  ;;  %v310_v12 = vpop.permute.xlu1 %309 }
 0x120   : > { %v302_v8 = vpop.permute.xlu0 %301 }
 0x121   : > { %v304_v9 = vadd.f32 %v302_v8, %v297_v7 }
 0x123   : > { %v305_v10 = vmax.f32 %v304_v9, 0.0 }
 0x125   : > { %541 = vmatpush3.msk.msra.mxu0 %vm317_vm1, %v305_v10 }
 0x126   : > { %543 = vmatmul.mubr.msk.f32.vlgmr.msra.gmra.mrb[0].mxu0 %vm313_vm2, %v312_v11 }
 0x1f9   : > { %v387_v13 = vpop.f32.mrb[0].mxu0 }
 0x1fa   : > { %v391_v14 = vadd.f32 %v387_v13, %v310_v12  ;;  %v544_v15 = vpop.f32.mrb[1].mxu0 }
 0x1fc   : > { %393 = vst.msk [vmem:[%s289_s7] sm:$0x7] %vm392_vm3, %v391_v14 }
 0x1fd   : > { %792 = shalt.err (!%p789_p0)
}
 0x1fe   : > { %s793_s14 = scalar_lea.hbm %s1137_s22, 64  ;;  %s797_s26 = scalar_lea.hbm %s1186_s5, 128 }
 0x1ff   : > { %p794_p2 = scmp.ne.s32.totalorder %s1137_s22, %s793_s14  ;;  %p798_p4 = scmp.lt.u32.totalorder %s1137_s22, %s1186_s5 }
 0x200   : > { %p799_p11 = scmp.lt.u32.totalorder %s797_s26, %s793_s14  ;;  %p801_p6 = scmp.lt.u32.totalorder %s793_s14, %s1137_s22 }
 0x201   : > { %p795_p8 = pnand %p794_p2, %p1204_p5 }
 0x202   : > { %p800_p1 = por %p799_p11, %p798_p4 }
 0x203   : > { %p796_p10 = pneg %p795_p8 }
 0x204   : > { %p802_p7 = por %p801_p6, %p800_p1 }
 0x206   : > { %p803_p9 = pnand %p802_p7, %p796_p10 }
 0x208   : > { %806 = shalt.err (!%p803_p9)
}
 0x209   : > { %563 = dma.vmem_to_hbm [thread:$0]  (%p1204_p5), %s1139_s15, 64, %s1137_s22, %s395_s27  }
 0x20a PF: > { %s420_s25 = sand.u32 1, %s841_s18   ;;  %p1205_p12 = scmp.ne.s32.totalorder %s1197_s10, 0 }
 0x20b   : > { %p1206_p3 = scmp.ge.s32.totalorder %s853_s21, 2  ;;  %s421_s7 = scalar_lea.sflag [#allocation4], %s420_s25 }
 0x20d   : > { %p583_p13 = pnand %p1206_p3, %p1205_p12 }
 0x20f   : > { %836 = dma.done.wait (!%p583_p13), %s421_s7, 64  }
 0x210   : > { %838 = vsyncadd (!%p583_p13), %s421_s7, 4294967232  ;;  %p20_p0 = scmp.ge.s32.totalorder %s1037_s30, 4   ;;  %s1207_s18 = smov %s845_s19 }
 0x211   : > { %s1208_s19 = smov %s849_s20  ;;  %s1209_s20 = smov %s1048_s6 }
 0x212   : > { %s1210_s21 = smov %s1037_s30  ;;  %22 = sbr.rel (!%p20_p0) target bundleno = 7 (0x7), region = 101 }
 0x219   :  { %426 = vsyncpa [#allocation3], 1 }
 0x21a   :  { %428 = vsyncpa [#allocation3 + $0x1], 1 }
 0x21b   :  { %429 = vsyncpa [#allocation6], 1 }
 0x21c   :  { %430 = vsyncpa [#allocation9], 1 }
 0x21d   :  { %431 = vsyncpa [#allocation4], 1 }
 0x21e   :  { %433 = vsyncpa [#allocation4 + $0x1], 1 }

// kernel: upsample_forward.2
= control target key start
LH: loop header
LB: loop body
LE: loop exit
PB: predicated region body
PF: predicated region fallthrough
CT: control target
= control target key end

     0   :  { %s2491_s0 = inlined_call_operand.hbm [shape: f32[2,4,256], index: 0, kind: input, shape index: {}]   ;;  %s2492_s1 = inlined_call_operand.hbm [shape: f32[2,4,256], index: 1, kind: input, shape index: {}]   ;;  %s2493_s2 = inlined_call_operand.hbm [shape: s32[1,256], index: 2, kind: input, shape index: {}]   ;;  %s2494_s3 = inlined_call_operand.hbm [shape: f32[4,1], index: 3, kind: input, shape index: {}]   ;;  %s2495_s4 = inlined_call_operand.hbm [shape: f32[4,1], index: 4, kind: input, shape index: {}]   ;;  %s2496_s5 = inlined_call_operand.hbm [shape: f32[9,8,4], index: 5, kind: input, shape index: {}]   ;;  %s2497_s6 = inlined_call_operand.hbm [shape: f32[8,1], index: 6, kind: input, shape index: {}]   ;;  %s2498_s7 = inlined_call_operand.hbm [shape: f32[2,8,256], index: 7, kind: output, shape index: {}]  }
   0x1   :  { %2503 = sst [smem:[#allocation22_spill]] %s2493_s2 }
   0x2   :  { %2504 = sst [smem:[#allocation23_spill]] %s2494_s3 }
   0x3   :  { %2505 = sst [smem:[#allocation24_spill]] %s2495_s4 }
   0x4   :  { %2506 = sst [smem:[#allocation25_spill]] %s2496_s5 }
   0x5   :  { %12 = vsyncpa [#allocation4], 0 }
   0x6   :  { %14 = vsyncpa [#allocation4 + $0x1], 0 }
   0x7   :  { %15 = vsyncpa [#allocation7], 0 }
   0x8   :  { %17 = vsyncpa [#allocation7 + $0x1], 0 }
   0x9   :  { %18 = vsyncpa [#allocation10], 0 }
   0xa   :  { %19 = vsyncpa [#allocation13], 0 }
   0xb   :  { %20 = vsyncpa [#allocation5], 0 }
   0xc   :  { %22 = vsyncpa [#allocation5 + $0x1], 0  ;;  %s2064_s24 = smov 0   ;;  %s2066_s25 = smov 0  }
   0xd   :  { %s2068_s26 = smov 0   ;;  %s2070_s27 = smov 0  }
   0xe LB: > { %s2002_s28 = smov [#allocation8]   ;;  %s2085_s30 = sadd.s32 4294967295, %s2000_s27   ;;  %s2000_s27 = sphi %s2070_s27, %s2533_s27   ;;  %s1996_s26 = sphi %s2068_s26, %s2532_s26   ;;  %s1992_s25 = sphi %s2066_s25, %s2531_s25   ;;  %s1988_s24 = sphi %s2064_s24, %s2530_s24  }
   0xf   : > { %s229_s29 = sshll.u32 %s2002_s28, 4  ;;  %p1524_p0 = scmp.ge.s32.totalorder %s2000_s27, 1  ;;  %s230_s29 = int_to_ptr.vmem [resolvable:$true] %s229_s29 }
  0x10   : > { %p2499_p1 = scmp.eq.s32.totalorder %s2085_s30, 0  ;;  %p216_p2 = scmp.lt.s32.totalorder %s2000_s27, 3 }
  0x11   : > { %s2003_s9 = smov [#allocation9]   ;;  %s2004_s11 = smov [#allocation12]  }
  0x12   : > { %p2090_p3 = pnand %p1524_p0, %p216_p2  ;;  %s240_s10 = sshll.u32 %s2003_s9, 4  ;;  %s2097_s10 = int_to_ptr.vmem [resolvable:$true] %s240_s10 }
  0x13   : > { %s261_s12 = sshll.u32 %s2004_s11, 4  ;;  %s2509_s2 = sld [smem:[#allocation22_spill]]  ;;  %s2105_s12 = int_to_ptr.vmem [resolvable:$true] %s261_s12 }
  0x14   : > { %s2507_s8 = scalar_select %p2090_p3, 1, 0 }
  0x15   : > { %p1625_p5 = pneg %p2090_p3 }
  0x17   : > { %p2101_p6 = pnand %p1625_p5, %p2499_p1 }
  0x19   : > { %s1718_s16 = scalar_lea.hbm %s2509_s2, 32  ;;  %p2115_p8 = pneg %p2101_p6 }
  0x1a   : > { %p1719_p7 = scmp.ne.s32.totalorder %s2509_s2, %s1718_s16  ;;  %p1725_p11 = scmp.lt.u32.totalorder %s1718_s16, %s2509_s2 }
  0x1c   : > { %p1721_p9 = pnand %p2115_p8, %p1719_p7 }
  0x1e   : > { %p1722_p10 = pneg %p1721_p9 }
  0x20   : > { %p1727_p12 = pnand %p1725_p11, %p1722_p10 }
  0x22   : > { %1730 = shalt.err (!%p1727_p12)
}
  0x23   : > { %s1731_s22 = scalar_lea.vmem %s230_s29, 32  ;;  %p1739_p5 = scmp.lt.s32.totalorder %s230_s29, %s230_s29 }
  0x24   : > { %p1732_p13 = scmp.ne.s32.totalorder %s230_s29, %s1731_s22  ;;  %p1740_p4 = scmp.lt.s32.totalorder %s1731_s22, %s1731_s22 }
  0x26   : > { %p1734_p0 = pnand %p1732_p13, %p2115_p8  ;;  %p1741_p1 = por %p1740_p4, %p1739_p5 }
  0x28   : > { %p1735_p2 = pneg %p1734_p0 }
  0x2a   : > { %p1742_p3 = pnand %p1741_p1, %p1735_p2 }
  0x2c   : > { %1745 = shalt.err (!%p1742_p3)
}
  0x2d   : > { %1628 = dma.hbm_to_vmem [thread:$0]  (!%p2101_p6), %s2509_s2, 32, %s230_s29, [#allocation7]  }
  0x2e   : > { %s2511_s3 = sld [smem:[#allocation23_spill]] }
  0x34   : > { %s1746_s14 = scalar_lea.hbm %s2511_s3, 64 }
  0x35   : > { %p1747_p7 = scmp.ne.s32.totalorder %s2511_s3, %s1746_s14  ;;  %p1753_p1 = scmp.lt.u32.totalorder %s1746_s14, %s2511_s3 }
  0x37   : > { %p1749_p9 = pnand %p1747_p7, %p2115_p8 }
  0x39   : > { %p1750_p4 = pneg %p1749_p9 }
  0x3b   : > { %p1755_p3 = pnand %p1753_p1, %p1750_p4 }
  0x3d   : > { %1758 = shalt.err (!%p1755_p3)
}
  0x3e   : > { %s1759_s29 = scalar_lea.vmem %s2097_s10, 64  ;;  %p1767_p13 = scmp.lt.s32.totalorder %s2097_s10, %s2097_s10 }
  0x3f   : > { %p1760_p10 = scmp.ne.s32.totalorder %s2097_s10, %s1759_s29  ;;  %p1768_p0 = scmp.lt.s32.totalorder %s1759_s29, %s1759_s29 }
  0x41   : > { %p1762_p11 = pnand %p1760_p10, %p2115_p8  ;;  %p1769_p2 = por %p1768_p0, %p1767_p13 }
  0x43   : > { %p1763_p12 = pneg %p1762_p11 }
  0x45   : > { %p1770_p5 = pnand %p1769_p2, %p1763_p12 }
  0x47   : > { %1773 = shalt.err (!%p1770_p5)
}
  0x48   : > { %1631 = dma.hbm_to_vmem [thread:$0]  (!%p2101_p6), %s2511_s3, 64, %s2097_s10, [#allocation10]  }
  0x49   : > { %s2512_s5 = sld [smem:[#allocation25_spill]] }
  0x4f   : > { %s1774_s28 = scalar_lea.hbm %s2512_s5, 1152 }
  0x50   : > { %p1775_p7 = scmp.ne.s32.totalorder %s2512_s5, %s1774_s28  ;;  %p1781_p1 = scmp.lt.u32.totalorder %s1774_s28, %s2512_s5 }
  0x52   : > { %p1777_p9 = pnand %p1775_p7, %p2115_p8 }
  0x54   : > { %p1778_p4 = pneg %p1777_p9 }
  0x56   : > { %p1783_p3 = pnand %p1781_p1, %p1778_p4 }
  0x58   : > { %1786 = shalt.err (!%p1783_p3)
}
  0x59   : > { %s1787_s10 = scalar_lea.vmem %s2105_s12, 1152  ;;  %p1795_p13 = scmp.lt.s32.totalorder %s2105_s12, %s2105_s12 }
  0x5a   : > { %p1788_p10 = scmp.ne.s32.totalorder %s2105_s12, %s1787_s10  ;;  %p1796_p0 = scmp.lt.s32.totalorder %s1787_s10, %s1787_s10 }
  0x5c   : > { %p1790_p11 = pnand %p1788_p10, %p2115_p8  ;;  %p1797_p2 = por %p1796_p0, %p1795_p13 }
  0x5e   : > { %p1791_p12 = pneg %p1790_p11 }
  0x60   : > { %p1798_p5 = pnand %p1797_p2, %p1791_p12 }
  0x62   : > { %1801 = shalt.err (!%p1798_p5)
}
  0x63   : > { %s2005_s16 = smov 128   ;;  %s2006_s17 = smov 8  }
  0x64   : > { %1637 = dma.hbm_to_vmem [thread:$0]  (!%p2101_p6), %s2512_s5, 1152, %s2105_s12, [#allocation13], %s2005_s16, %s2005_s16, %s2006_s17  }
  0x65   : > { %s2007_s20 = smov [#allocation11]   ;;  %s2008_s22 = smov [#allocation14]  }
  0x66   : > { %s251_s21 = sshll.u32 %s2007_s20, 4  ;;  %s275_s23 = sshll.u32 %s2008_s22, 4  ;;  %s252_s21 = int_to_ptr.vmem [resolvable:$true] %s251_s21  ;;  %s276_s23 = int_to_ptr.vmem [resolvable:$true] %s275_s23 }
  0x67   : > { %s2513_s4 = sld [smem:[#allocation24_spill]] }
  0x6d   : > { %s1802_s11 = scalar_lea.hbm %s2513_s4, 64 }
  0x6e   : > { %p1803_p7 = scmp.ne.s32.totalorder %s2513_s4, %s1802_s11  ;;  %p1809_p1 = scmp.lt.u32.totalorder %s1802_s11, %s2513_s4 }
  0x70   : > { %p1805_p9 = pnand %p1803_p7, %p2115_p8 }
  0x72   : > { %p1806_p4 = pneg %p1805_p9 }
  0x74   : > { %p1811_p3 = pnand %p1809_p1, %p1806_p4 }
  0x76   : > { %1814 = shalt.err (!%p1811_p3)
}
  0x77   : > { %s1815_s12 = scalar_lea.vmem %s252_s21, 64  ;;  %p1823_p13 = scmp.lt.s32.totalorder %s252_s21, %s252_s21 }
  0x78   : > { %p1816_p10 = scmp.ne.s32.totalorder %s252_s21, %s1815_s12  ;;  %p1824_p0 = scmp.lt.s32.totalorder %s1815_s12, %s1815_s12 }
  0x7a   : > { %p1818_p11 = pnand %p1816_p10, %p2115_p8  ;;  %p1825_p2 = por %p1824_p0, %p1823_p13 }
  0x7c   : > { %p1819_p12 = pneg %p1818_p11 }
  0x7e   : > { %p1826_p5 = pnand %p1825_p2, %p1819_p12 }
  0x80   : > { %1829 = shalt.err (!%p1826_p5)
}
  0x81   : > { %1634 = dma.hbm_to_vmem [thread:$0]  (!%p2101_p6), %s2513_s4, 64, %s252_s21, [#allocation10]  }
  0x82   : > { %s1830_s29 = scalar_lea.hbm %s2497_s6, 128 }
  0x83   : > { %p1831_p7 = scmp.ne.s32.totalorder %s2497_s6, %s1830_s29  ;;  %p1837_p1 = scmp.lt.u32.totalorder %s1830_s29, %s2497_s6 }
  0x85   : > { %p1833_p9 = pnand %p1831_p7, %p2115_p8 }
  0x87   : > { %p1834_p4 = pneg %p1833_p9 }
  0x89   : > { %p1839_p3 = pnand %p1837_p1, %p1834_p4 }
  0x8b   : > { %1842 = shalt.err (!%p1839_p3)
}
  0x8c   : > { %s1843_s11 = scalar_lea.vmem %s276_s23, 128  ;;  %p1851_p13 = scmp.lt.s32.totalorder %s276_s23, %s276_s23 }
  0x8d   : > { %p1844_p10 = scmp.ne.s32.totalorder %s276_s23, %s1843_s11  ;;  %p1852_p0 = scmp.lt.s32.totalorder %s1843_s11, %s1843_s11 }
  0x8f   : > { %p1846_p11 = pnand %p1844_p10, %p2115_p8  ;;  %p1853_p2 = por %p1852_p0, %p1851_p13 }
  0x91   : > { %p1847_p12 = pneg %p1846_p11 }
  0x93   : > { %p1854_p5 = pnand %p1853_p2, %p1847_p12 }
  0x95   : > { %1857 = shalt.err (!%p1854_p5)
}
  0x96   : > { %1640 = dma.hbm_to_vmem [thread:$0]  (!%p2101_p6), %s2497_s6, 128, %s276_s23, [#allocation13]  }
  0x97   : > { %s1523_s19 = sadd.s32 4294967294, %s2000_s27   ;;  %s2215_s13 = sadd.s32 1, %s2000_s27  }
  0x98   : > { %s35_s15 = sadd.s32 1, %s1996_s26  ;;  %s32_s10 = ssub.s32 %s2000_s27, %s2215_s13 }
  0x99   : > { %p42_p8 = scmp.ne.s32.totalorder %s1996_s26, %s1992_s25  ;;  %p33_p7 = scmp.eq.s32.totalorder %s32_s10, 0 }
  0x9a   : > { %p43_p9 = scmp.eq.s32.totalorder %s2000_s27, 0  ;;  %p48_p4 = scmp.ne.s32.totalorder %s1992_s25, %s1988_s24 }
  0x9b   : > { %p203_p1 = scmp.eq.s32.totalorder %s2085_s30, 1  ;;  %p2514_p10 = scmp.eq.s32.totalorder %s2085_s30, 0 }
  0x9c   : > { %s2227_s12 = scalar_select %p33_p7, %s1996_s26, %s35_s15  }
  0x9d   : > { %p44_p3 = por %p43_p9, %p42_p8  ;;  %p2231_p11 = por %p2514_p10, %p48_p4 }
  0x9e   : > { %p2235_p6 = por %p203_p1, %p42_p8  ;;  %p209_p12 = scmp.eq.s32.totalorder %s1523_s19, 1 }
  0x9f   : > { %s2515_s16 = scalar_select %p2231_p11, 1, 0 }
  0xa0   : > { %s2516_s23 = scalar_select %p2235_p6, 1, 0 }
  0xa1   : > { %p1657_p13 = scmp.lt.s32.totalorder %s2000_s27, 2  ;;  %s286_s17 = sand.u32 1, %s1996_s26  }
  0xa2   : > { %p2241_p0 = por %p209_p12, %p48_p4  ;;  %s2245_s18 = sshll.u32 %s286_s17, 3 }
  0xa3   : > { %s1578_s29 = sshll.u32 %s2000_s27, 7  ;;  %s290_s9 = scalar_lea.vmem [#allocation3], %s2245_s18 }
  0xa4   : > { %s2517_s2 = scalar_select %p2241_p0, 1, 0 }
  0xa5   : > { %s2251_s28 = scalar_lea.hbm %s2491_s0, %s1578_s29  ;;  %s298_s11 = sshll.u32 %s290_s9, 4  ;;  %s2258_s11 = int_to_ptr.vmem [resolvable:$true] %s298_s11 }
  0xa6   : > { %p2254_p2 = pnand %p1657_p13, %p44_p3  ;;  %s2263_s15 = scalar_lea.hbm %s2492_s1, %s1578_s29 }
  0xa7   : > { %s287_s10 = scalar_lea.sflag [#allocation4], %s286_s17  ;;  %s1858_s20 = scalar_lea.hbm %s2251_s28, 128 }
  0xa8   : > { %p1859_p5 = scmp.ne.s32.totalorder %s2251_s28, %s1858_s20  ;;  %p1860_p8 = pneg %p2254_p2 }
  0xa9   : > { %s1863_s3 = scalar_lea.hbm %s2491_s0, 256  ;;  %p1864_p4 = scmp.lt.u32.totalorder %s2251_s28, %s2491_s0 }
  0xaa   : > { %p1861_p7 = pnand %p1860_p8, %p1859_p5  ;;  %p1865_p1 = scmp.lt.u32.totalorder %s1863_s3, %s1858_s20 }
  0xab   : > { %p1867_p10 = scmp.lt.u32.totalorder %s1858_s20, %s2251_s28 }
  0xac   : > { %p1862_p9 = pneg %p1861_p7  ;;  %p1866_p3 = por %p1865_p1, %p1864_p4 }
  0xae   : > { %p1868_p12 = por %p1867_p10, %p1866_p3 }
  0xb0   : > { %p1869_p13 = pnand %p1868_p12, %p1862_p9 }
  0xb2   : > { %1872 = shalt.err (!%p1869_p13)
}
  0xb3   : > { %s1873_s17 = scalar_lea.vmem %s2258_s11, 128  ;;  %s2009_s29 = smov [#allocation3]  }
  0xb4   : > { %p1874_p5 = scmp.ne.s32.totalorder %s2258_s11, %s1873_s17  ;;  %s1878_s14 = sshll.u32 %s2009_s29, 4  ;;  %s1879_s14 = int_to_ptr.vmem [resolvable:$false] %s1878_s14 }
  0xb5   : > { %s1880_s4 = scalar_lea.vmem %s1879_s14, 256  ;;  %p1881_p6 = scmp.lt.s32.totalorder %s2258_s11, %s1879_s14 }
  0xb6   : > { %p1876_p7 = pnand %p1874_p5, %p1860_p8  ;;  %p1882_p4 = scmp.lt.s32.totalorder %s1880_s4, %s1873_s17 }
  0xb8   : > { %p1877_p0 = pneg %p1876_p7  ;;  %p1883_p1 = por %p1882_p4, %p1881_p6 }
  0xba   : > { %p1884_p3 = pnand %p1883_p1, %p1877_p0 }
  0xbc   : > { %1887 = shalt.err (!%p1884_p3)
}
  0xbd   : > { %1644 = dma.hbm_to_vmem [thread:$0]  (!%p2254_p2), %s2251_s28, 128, %s2258_s11, %s287_s10  }
  0xbe   : > { %s305_s3 = sand.u32 1, %s2000_s27   ;;  %s309_s5 = scalar_lea.vmem [#allocation6], %s2245_s18 }
  0xbf   : > { %s317_s19 = sshll.u32 %s309_s5, 4  ;;  %s306_s20 = scalar_lea.sflag [#allocation7], %s305_s3  ;;  %s318_s19 = int_to_ptr.vmem [resolvable:$true] %s317_s19 }
  0xc0   : > { %s1888_s22 = scalar_lea.hbm %s2263_s15, 128  ;;  %s1893_s29 = scalar_lea.hbm %s2492_s1, 256 }
  0xc1   : > { %p1889_p6 = scmp.ne.s32.totalorder %s2263_s15, %s1888_s22  ;;  %p1894_p10 = scmp.lt.u32.totalorder %s2263_s15, %s2492_s1 }
  0xc2   : > { %p1895_p12 = scmp.lt.u32.totalorder %s1893_s29, %s1888_s22  ;;  %p1897_p5 = scmp.lt.u32.totalorder %s1888_s22, %s2263_s15 }
  0xc3   : > { %p1891_p0 = pnand %p1889_p6, %p1860_p8 }
  0xc4   : > { %p1896_p13 = por %p1895_p12, %p1894_p10 }
  0xc5   : > { %p1892_p9 = pneg %p1891_p0 }
  0xc6   : > { %p1898_p7 = por %p1897_p5, %p1896_p13 }
  0xc8   : > { %p1899_p4 = pnand %p1898_p7, %p1892_p9 }
  0xca   : > { %1902 = shalt.err (!%p1899_p4)
}
  0xcb   : > { %s1903_s18 = scalar_lea.vmem %s318_s19, 128  ;;  %s2010_s28 = smov [#allocation6]  }
  0xcc   : > { %p1904_p1 = scmp.ne.s32.totalorder %s318_s19, %s1903_s18  ;;  %s1908_s11 = sshll.u32 %s2010_s28, 4  ;;  %s1909_s11 = int_to_ptr.vmem [resolvable:$false] %s1908_s11 }
  0xcd   : > { %s1910_s10 = scalar_lea.vmem %s1909_s11, 256  ;;  %p1911_p0 = scmp.lt.s32.totalorder %s318_s19, %s1909_s11 }
  0xce   : > { %p1906_p3 = pnand %p1904_p1, %p1860_p8  ;;  %p1912_p11 = scmp.lt.s32.totalorder %s1910_s10, %s1903_s18 }
  0xd0   : > { %p1907_p6 = pneg %p1906_p3  ;;  %p1913_p10 = por %p1912_p11, %p1911_p0 }
  0xd2   : > { %p1914_p12 = pnand %p1913_p10, %p1907_p6 }
  0xd4   : > { %1917 = shalt.err (!%p1914_p12)
}
  0xd5   : > { %1647 = dma.hbm_to_vmem [thread:$0]  (!%p2254_p2), %s2263_s15, 128, %s318_s19, %s306_s20  }
  0xd6   : > { %p2519_p9 = scmp.ne.s32.totalorder %s2507_s8, 0 }
  0xd7   : > { %s2314_s3 = sand.u32 (!%p2519_p9), 1, %s1992_s25   ;;  %p2520_p11 = scmp.ne.s32.totalorder (!%p2519_p9), %s2515_s16, 0 }
  0xd8   : > { %326 = sbr.rel (%p2519_p9) target bundleno = 893 (0x37d), region = 48  ;;  %s1538_s5 = sshll.u32 (!%p2519_p9), %s2314_s3, 3 }
  0xd9   : > { %s329_s22 = scalar_lea.sflag (!%p2519_p9), [#allocation4], %s2314_s3  ;;  %s2318_s9 = scalar_lea.vmem (!%p2519_p9), [#allocation3], %s1538_s5 }
  0xdf   : > { %1963 = dma.done.wait (%p2520_p11), %s329_s22, 128  }
  0xe0   : > { %1965 = vsyncadd (%p2520_p11), %s329_s22, 4294967168  ;;  %s337_s21 = sand.u32 1, %s2085_s30   ;;  %s2325_s15 = scalar_lea.vmem [#allocation6], %s1538_s5 }
  0xe1   : > { %s338_s8 = scalar_lea.sflag [#allocation7], %s337_s21 }
  0xe2   : > { %1967 = dma.done.wait (%p2520_p11), %s338_s8, 128  }
  0xe3   : > { %1969 = vsyncadd (%p2520_p11), %s338_s8, 4294967168  ;;  %p2521_p2 = scmp.eq.s32.totalorder %s2085_s30, 0 }
  0xe5   : > { %1971 = dma.done.wait (%p2521_p2), [#allocation7], 32   ;;  %p2522_p8 = pmov %p2521_p2 }
  0xe6   : > { %p2523_p13 = pmov %p2521_p2 }
  0xe7   : > { %1973 = vsyncadd (%p2522_p8), [#allocation7], 4294967264 }
  0xe8   : > { %1975 = dma.done.wait (%p2523_p13), [#allocation10], 128   ;;  %p2524_p5 = pmov %p2521_p2 }
  0xe9   : > { %p2525_p7 = pmov %p2521_p2 }
  0xea   : > { %1977 = vsyncadd (%p2524_p5), [#allocation10], 4294967168 }
  0xeb   : > { %1979 = dma.done.wait (%p2525_p7), [#allocation13], 1280   ;;  %p2526_p4 = pmov %p2521_p2 }
  0xec   : > { %v2011_v0 = vmov 0   ;;  %v400_v1 = vld [vmem:[#allocation9] sm:$0xf]  ;;  %v414_v2 = vld [vmem:[#allocation11] sm:$0xf]  ;;  %vm435_vm0 = vcmask 134144   ;;  %v408_v6 = vlaneseq }
  0xed   : > { %1981 = vsyncadd (%p2526_p4), [#allocation13], 4294966016  ;;  %1715 = vset.pattern.permute.xlu0 %v2011_v0  ;;  %1716 = vset.pattern.permute.xlu1 %v2011_v0  ;;  %vm437_vm1 = vcmask 273544   ;;  %v2012_v3 = vmov 0.0   ;;  %v2013_v4 = vmov 839922192  }
  0xee   : > { %403 = vperm.xlu0 %1715, %v400_v1   ;;  %436 = vst.msk [vmem:[#allocation2] sm:$0xf] %vm435_vm0, %v2012_v3  ;;  %955 = vmatprep.mubr.f32.mxu0 %v2012_v3  ;;  %v406_v5 = vunpack.c.l.s4 %v2013_v4  ;;  %v2350_v8 = vshrl.u32 %v408_v6, 7  ;;  %v397_v10 = vld [vmem:[%s2318_s9] sm:$0xff]  ;;  %v398_v11 = vld [vmem:[%s2325_s15] sm:$0xff]  ;;  %s2014_s16 = smov 17  }
  0xef   : > { %438 = vst.msk [vmem:[#allocation2 + $0x8] sm:$0xf] %vm437_vm1, %v2012_v3  ;;  %547 = vmatprep.mubr.f32.mxu1 %v2012_v3  ;;  %v399_v13 = vadd.f32 %v398_v11, %v397_v10  ;;  %vm447_vm2 = vcmask 1043592   ;;  %vm448_vm3 = vcmask 1047556   ;;  %vm443_vm4 = vcmask 138240   ;;  %s2015_s19 = smov 110  }
  0xf0   : > { %v407_v7 = vunpack.c.0.s8 %v406_v5  ;;  %v2355_v21 = vld [vmem:[#allocation8] sm:$0x3]  ;;  %vm449_vm5 = vmor %vm448_vm3, %vm447_vm2  ;;  %v462_v24 = vsub.s32 1, %v2350_v8  ;;  %v458_v25 = vsub.s32 0, %v2350_v8  ;;  %s2016_s20 = smov 111   ;;  %vm476_vm8 = vcmask 1043456  }
  0xf1   : > { %vm454_vm6 = vcmp.ge.s32.totalorder %v2355_v21, 1  ;;  %s2017_s17 = smov 127   ;;  %vm472_vm10 = vcmask 31744   ;;  %v471_v36 = vld [vmem:[#allocation12] sm:$0xff]  ;;  %s2018_s29 = smov 96   ;;  %v429_v42 = vld [vmem:[#allocation14] sm:$0xff] }
  0xf2   : > { %417 = vperm.xlu0 %1715, %v414_v2   ;;  %v410_v9 = vsub.s32 %v407_v7, %v2350_v8  ;;  %v455_v26 = vsel %vm454_vm6, 1, %v2011_v0  ;;  %s2019_s14 = smov 126   ;;  %s2020_s4 = smov 95   ;;  %vm654_vm11 = vcmp.lt.s32.totalorder %v2355_v21, 15  ;;  %vm881_vm12 = vcmask 908288   ;;  %v871_v56 = vld [vmem:[#allocation12 + $0x20] sm:$0xff] }
  0xf3   : > { %v2364_v27 = vrot.slane %v455_v26, %v462_v24  ;;  %v2368_v28 = vrot.slane %v455_v26, %v458_v25  ;;  %s2021_s18 = smov 112   ;;  %s2022_s28 = smov 94   ;;  %v655_v49 = vsel %vm654_vm11, 1, %v2011_v0  ;;  %vm975_vm13 = vcmask 900096   ;;  %v983_v1 = vld [vmem:[#allocation12 + $0x28] sm:$0xff]  ;;  %v683_v21 = vld [vmem:[#allocation12 + $0x10] sm:$0xff] }
  0xf4   : > { %v2384_v50 = vrot.slane %v655_v49, %v458_v25  ;;  %v2388_v51 = vrot.slane %v655_v49, %v462_v24  ;;  %vm569_vm1 = vcmask 1039360   ;;  %vm675_vm2 = vcmask 1031168   ;;  %v1171_v26 = vld [vmem:[#allocation12 + $0x38] sm:$0xff]  ;;  %s1545_s11 = sshll.u32 %s2314_s3, 4  ;;  %s1580_s10 = sshll.u32 %s2085_s30, 8 }
  0xf5   : > { %vm465_vm7 = vcmp.eq.s32.totalorder %v2364_v27, 1  ;;  %vm464_vm9 = vcmp.eq.s32.totalorder %v2368_v28, 1  ;;  %vm1181_vm3 = vcmask 777216   ;;  %v1283_v28 = vld [vmem:[#allocation12 + $0x40] sm:$0xff]  ;;  %s396_s5 = scalar_lea.vmem [#allocation15], %s1545_s11  ;;  %s2447_s8 = scalar_lea.hbm %s2498_s7, %s1580_s10 }
  0xf6   : > { %vm664_vm14 = vcmp.eq.s32.totalorder %v2384_v50, 1  ;;  %vm665_vm15 = vcmp.eq.s32.totalorder %v2388_v51, 1  ;;  %s1383_s22 = sshll.u32 %s396_s5, 4  ;;  %s1369_s30 = scalar_lea.sflag [#allocation5], %s2314_s3  ;;  %s2449_s22 = int_to_ptr.vmem [resolvable:$true] %s1383_s22 }
  0xf7   : > { %s1918_s15 = scalar_lea.vmem %s2449_s22, 256  ;;  %p2527_p3 = scmp.ne.s32.totalorder %s2516_s23, 0 }
  0xf8   : > { %p1919_p1 = scmp.ne.s32.totalorder %s2449_s22, %s1918_s15 }
  0xfa   : > { %p1920_p6 = pnand %p1919_p1, %p2527_p3 }
  0xfc   : > { %p1921_p0 = pneg %p1920_p6 }
 0x16d   : > { %v404_v12 = vpop.permute.xlu0 %403 }
 0x16e   : > { %v411_v14 = vrot.slane %v404_v12, %v410_v9 }
 0x170   : > { %v413_v16 = vmul.f32 %v411_v14, %v399_v13  ;;  %v1085_v14 = vld [vmem:[#allocation12 + $0x30] sm:$0xff] }
 0x171   : > { %v418_v15 = vpop.permute.xlu0 %417 }
 0x172   : > { %v425_v17 = vrot.slane %v418_v15, %v410_v9  ;;  %v559_v9 = vld [vmem:[#allocation12 + $0x8] sm:$0xff] }
 0x174   : > { %v427_v18 = vadd.f32 %v425_v17, %v413_v16 }
 0x176   : > { %v428_v19 = vmax.f32 %v427_v18, 0.0 }
 0x178   : > { %440 = vrot.lane.b32.xlu1 %v428_v19, %s2014_s16  ;;  %s2023_s16 = smov [#allocation15]  }
 0x1ea   : > { %v441_v20 = vpop.permute.xlu1 %440 }
 0x1eb   : > { %v442_v22 = vrot.slane %v441_v20, 4 }
 0x1ed   : > { %v444_v23 = vsel %vm443_vm4, %v442_v22, %v441_v20  ;;  %451 = vst.msk [vmem:[#allocation2 + $0x8] sm:$0xf] %vm435_vm0, %v442_v22  ;;  %vm1077_vm0 = vcmask 785408   ;;  %vm777_vm4 = vcmask 916480  }
 0x1ee   : > { %450 = vst.msk [vmem:[#allocation2] sm:$0xff] %vm449_vm5, %v444_v23  ;;  %vm1275_vm5 = vcmask 769024  }
 0x1f4   : > { %v965_v29 = vld [vmem:[#allocation2 + $0x8] sm:$0xf] }
 0x1f5   : > { %v869_v30 = vld [vmem:[#allocation2 + $0x8] sm:$0xf]  ;;  %973 = vrot.lane.b32.xlu1 %v965_v29, %s2015_s19  ;;  %v868_v31 = vld [vmem:[#allocation2] sm:$0xff] }
 0x1f6   : > { %879 = vrot.lane.b32.xlu0 %v869_v30, %s2016_s20  ;;  %v874_v32 = vcombine.high %v868_v31, %v868_v31  ;;  %v557_v33 = vld [vmem:[#allocation2 + $0x8] sm:$0xf]  ;;  %v469_v35 = vsel %vm464_vm9, %v868_v31, 0.0 }
 0x1f7   : > { %v1067_v37 = vld [vmem:[#allocation2 + $0x8] sm:$0xf] }
 0x1f8   : > { %v470_v34 = vsel %vm465_vm7, %v874_v32, 0.0  ;;  %v653_v38 = vld [vmem:[#allocation2 + $0x8] sm:$0xf] }
 0x1f9   : > { %875 = vrot.lane.b32.xlu1 %v868_v31, %s2016_s20  ;;  %1546 = vmatprep.subr.msk.mxu1 %vm476_vm8, %v470_v34  ;;  %v1169_v39 = vld [vmem:[#allocation2 + $0x8] sm:$0xf] }
 0x1fa   : > { %567 = vrot.lane.b32.xlu0 %v557_v33, %s2017_s17  ;;  %1547 = vmatpush1.msk.msra.mxu1 %vm476_vm8, %v469_v35  ;;  %v767_v40 = vld [vmem:[#allocation2 + $0x8] sm:$0xf]  ;;  %v785_v35 = vld [vmem:[#allocation12 + $0x18] sm:$0xff] }
 0x1fb   : > { %1548 = vmatmul.mubr.msk.f32.vlgmr.msra.gmra.mrb[0].mxu1 %vm472_vm10, %v471_v36  ;;  %v1265_v41 = vld [vmem:[#allocation2 + $0x8] sm:$0xf] }
 0x1fc   : > { %643 = vmatprep.mubr.f32.mxu1 %v2012_v3 }
 0x1fd   : > { %563 = vrot.lane.b32.xlu1 %v868_v31, %s2017_s17 }
 0x1fe   : > { %969 = vrot.lane.b32.xlu0 %v868_v31, %s2015_s19 }
 0x201   : > { %877 = vrot.lane.b32.xlu1 %v874_v32, %s2016_s20 }
 0x202   : > { %1071 = vrot.lane.b32.xlu0 %v868_v31, %s2018_s29 }
 0x205   : > { %1075 = vrot.lane.b32.xlu1 %v1067_v37, %s2018_s29 }
 0x206   : > { %971 = vrot.lane.b32.xlu0 %v874_v32, %s2015_s19  ;;  %s1922_s19 = sshll.u32 %s2023_s16, 4  ;;  %s1923_s19 = int_to_ptr.vmem [resolvable:$false] %s1922_s19 }
 0x207   : > { %s1924_s20 = scalar_lea.vmem %s1923_s19, 512  ;;  %p1925_p10 = scmp.lt.s32.totalorder %s2449_s22, %s1923_s19 }
 0x208   : > { %p1926_p12 = scmp.lt.s32.totalorder %s1924_s20, %s1918_s15 }
 0x209   : > { %669 = vrot.lane.b32.xlu1 %v868_v31, %s2019_s14 }
 0x20a   : > { %673 = vrot.lane.b32.xlu0 %v653_v38, %s2019_s14  ;;  %p1927_p9 = por %p1926_p12, %p1925_p10 }
 0x20c   : > { %p1928_p11 = pnand %p1927_p9, %p1921_p0 }
 0x20d   : > { %565 = vrot.lane.b32.xlu1 %v874_v32, %s2017_s17 }
 0x20e   : > { %1073 = vrot.lane.b32.xlu0 %v874_v32, %s2018_s29 }
 0x211   : > { %1179 = vrot.lane.b32.xlu1 %v1169_v39, %s2020_s4 }
 0x212   : > { %1175 = vrot.lane.b32.xlu0 %v868_v31, %s2020_s4 }
 0x215   : > { %671 = vrot.lane.b32.xlu1 %v874_v32, %s2019_s14 }
 0x216   : > { %775 = vrot.lane.b32.xlu0 %v767_v40, %s2021_s18 }
 0x219   : > { %771 = vrot.lane.b32.xlu1 %v868_v31, %s2021_s18 }
 0x21a   : > { %1177 = vrot.lane.b32.xlu0 %v874_v32, %s2020_s4 }
 0x21d   : > { %773 = vrot.lane.b32.xlu1 %v874_v32, %s2021_s18 }
 0x21e   : > { %1271 = vrot.lane.b32.xlu0 %v874_v32, %s2022_s28 }
 0x221   : > { %1273 = vrot.lane.b32.xlu1 %v1265_v41, %s2022_s28 }
 0x222   : > { %1269 = vrot.lane.b32.xlu0 %v868_v31, %s2022_s28 }
 0x225   : > { %432 = vperm.xlu1 %1716, %v429_v42  }
 0x267   : > { %v974_v43 = vpop.permute.xlu1 %973 }
 0x268   : > { %v880_v44 = vpop.permute.xlu0 %879 }
 0x26b   : > { %v876_v46 = vpop.permute.xlu1 %875 }
 0x26c   : > { %v568_v45 = vpop.permute.xlu0 %567 }
 0x26f   : > { %v564_v48 = vpop.permute.xlu1 %563 }
 0x270   : > { %v970_v47 = vpop.permute.xlu0 %969 }
 0x273   : > { %v878_v53 = vpop.permute.xlu1 %877 }
 0x274   : > { %v1072_v52 = vpop.permute.xlu0 %1071  ;;  %v883_v54 = vsel %vm881_vm12, %v878_v53, %v880_v44  ;;  %v882_v55 = vsel %vm881_vm12, %v876_v46, %v878_v53 }
 0x275   : > { %1558 = vmatprep.subr.msk.mxu0 %vm476_vm8, %v883_v54 }
 0x276   : > { %1559 = vmatpush1.msk.msra.mxu0 %vm476_vm8, %v882_v55 }
 0x277   : > { %v1076_v58 = vpop.permute.xlu1 %1075  ;;  %1560 = vmatmul.mubr.msk.f32.vlgmr.msra.gmra.mrb[0].mxu0 %vm472_vm10, %v871_v56 }
 0x278   : > { %v972_v57 = vpop.permute.xlu0 %971  ;;  %1057 = vmatprep.mubr.f32.mxu0 %v2012_v3 }
 0x279   : > { %v976_v59 = vsel %vm975_vm13, %v970_v47, %v972_v57  ;;  %v977_v60 = vsel %vm975_vm13, %v972_v57, %v974_v43 }
 0x27a   : > { %v980_v61 = vsel %vm664_vm14, %v976_v59, 0.0  ;;  %v981_v62 = vsel %vm665_vm15, %v977_v60, 0.0 }
 0x27b   : > { %1561 = vmatprep.subr.msk.mxu0 %vm476_vm8, %v981_v62  ;;  %v670_v0 = vpop.permute.xlu1 %669 }
 0x27c   : > { %v674_v63 = vpop.permute.xlu0 %673  ;;  %1562 = vmatpush1.msk.msra.mxu0 %vm476_vm8, %v980_v61 }
 0x27f   : > { %v566_v4 = vpop.permute.xlu1 %565  ;;  %1563 = vmatmul.mubr.msk.f32.vlgmr.msra.gmra.mrb[0].mxu0 %vm472_vm10, %v983_v1 }
 0x280   : > { %v1074_v2 = vpop.permute.xlu0 %1073  ;;  %v570_v7 = vsel %vm569_vm1, %v564_v48, %v566_v4  ;;  %v571_v8 = vsel %vm569_vm1, %v566_v4, %v568_v45  ;;  %1159 = vmatprep.mubr.f32.mxu0 %v2012_v3 }
 0x281   : > { %v1078_v5 = vsel %vm1077_vm0, %v1072_v52, %v1074_v2  ;;  %v1079_v6 = vsel %vm1077_vm0, %v1074_v2, %v1076_v58  ;;  %1549 = vmatprep.subr.msk.mxu1 %vm476_vm8, %v571_v8 }
 0x282   : > { %v1082_v10 = vsel %vm464_vm9, %v1078_v5, 0.0  ;;  %v1083_v11 = vsel %vm465_vm7, %v1079_v6, 0.0  ;;  %1550 = vmatpush1.msk.msra.mxu1 %vm476_vm8, %v570_v7 }
 0x283   : > { %1564 = vmatprep.subr.msk.mxu0 %vm476_vm8, %v1083_v11  ;;  %v1180_v13 = vpop.permute.xlu1 %1179  ;;  %1551 = vmatmul.mubr.msk.f32.vlgmr.msra.gmra.mrb[0].mxu1 %vm472_vm10, %v559_v9 }
 0x284   : > { %v1176_v12 = vpop.permute.xlu0 %1175  ;;  %1565 = vmatpush1.msk.msra.mxu0 %vm476_vm8, %v1082_v10  ;;  %757 = vmatprep.mubr.f32.mxu1 %v2012_v3 }
 0x287   : > { %v672_v16 = vpop.permute.xlu1 %671  ;;  %1566 = vmatmul.mubr.msk.f32.vlgmr.msra.gmra.mrb[0].mxu0 %vm472_vm10, %v1085_v14 }
 0x288   : > { %v776_v15 = vpop.permute.xlu0 %775  ;;  %v676_v17 = vsel %vm675_vm2, %v670_v0, %v672_v16  ;;  %v677_v18 = vsel %vm675_vm2, %v672_v16, %v674_v63  ;;  %1255 = vmatprep.mubr.f32.mxu0 %v2012_v3 }
 0x289   : > { %v680_v19 = vsel %vm664_vm14, %v676_v17, 0.0  ;;  %v681_v20 = vsel %vm665_vm15, %v677_v18, 0.0 }
 0x28a   : > { %1552 = vmatprep.subr.msk.mxu1 %vm476_vm8, %v681_v20 }
 0x28b   : > { %v772_v23 = vpop.permute.xlu1 %771  ;;  %1553 = vmatpush1.msk.msra.mxu1 %vm476_vm8, %v680_v19 }
 0x28c   : > { %v1178_v22 = vpop.permute.xlu0 %1177  ;;  %1554 = vmatmul.mubr.msk.f32.vlgmr.msra.gmra.mrb[0].mxu1 %vm472_vm10, %v683_v21 }
 0x28d   : > { %v1182_v24 = vsel %vm1181_vm3, %v1176_v12, %v1178_v22  ;;  %v1183_v25 = vsel %vm1181_vm3, %v1178_v22, %v1180_v13  ;;  %859 = vmatprep.mubr.f32.mxu1 %v2012_v3 }
 0x28e   : > { %1567 = vmatprep.subr.msk.mxu0 %vm476_vm8, %v1183_v25 }
 0x28f   : > { %1568 = vmatpush1.msk.msra.mxu0 %vm476_vm8, %v1182_v24  ;;  %v774_v30 = vpop.permute.xlu1 %773 }
 0x290   : > { %v1272_v29 = vpop.permute.xlu0 %1271  ;;  %1569 = vmatmul.mubr.msk.f32.vlgmr.msra.gmra.mrb[0].mxu0 %vm472_vm10, %v1171_v26  ;;  %v778_v31 = vsel %vm777_vm4, %v772_v23, %v774_v30  ;;  %v779_v32 = vsel %vm777_vm4, %v774_v30, %v776_v15 }
 0x291   : > { %1357 = vmatprep.mubr.f32.mxu0 %v2012_v3  ;;  %v782_v33 = vsel %vm464_vm9, %v778_v31, 0.0  ;;  %v783_v34 = vsel %vm465_vm7, %v779_v32, 0.0 }
 0x292   : > { %1555 = vmatprep.subr.msk.mxu1 %vm476_vm8, %v783_v34 }
 0x293   : > { %v1274_v37 = vpop.permute.xlu1 %1273  ;;  %1556 = vmatpush1.msk.msra.mxu1 %vm476_vm8, %v782_v33 }
 0x294   : > { %v1270_v36 = vpop.permute.xlu0 %1269  ;;  %v1277_v39 = vsel %vm1275_vm5, %v1272_v29, %v1274_v37  ;;  %1557 = vmatmul.mubr.msk.f32.vlgmr.msra.gmra.mrb[0].mxu1 %vm472_vm10, %v785_v35 }
 0x295   : > { %v1276_v38 = vsel %vm1275_vm5, %v1270_v36, %v1272_v29  ;;  %v1281_v27 = vsel %vm665_vm15, %v1277_v39, 0.0 }
 0x296   : > { %v1280_v3 = vsel %vm664_vm14, %v1276_v38, 0.0  ;;  %1570 = vmatprep.subr.msk.mxu0 %vm476_vm8, %v1281_v27 }
 0x297   : > { %1571 = vmatpush1.msk.msra.mxu0 %vm476_vm8, %v1280_v3 }
 0x298   : > { %1572 = vmatmul.mubr.msk.f32.vlgmr.msra.gmra.mrb[0].mxu0 %vm472_vm10, %v1283_v28 }
 0x2a4   : > { %v433_v40 = vpop.permute.xlu1 %432 }
 0x367   : > { %v861_v41 = vpop.f32.mrb[0].mxu1 }
 0x368   : > { %v863_v42 = vpop.f32.mrb[1].mxu1  ;;  %v1581_v43 = vadd.f32 %v861_v41, %v433_v40 }
 0x369   : > { %v1583_v44 = vadd.f32 %v863_v42, %v433_v40 }
 0x36b   : > { %v1359_v45 = vpop.f32.mrb[0].mxu0 }
 0x36c   : > { %v1582_v46 = vadd.f32 %v1581_v43, %v1359_v45  ;;  %v1361_v47 = vpop.f32.mrb[1].mxu0 }
 0x36d   : > { %v1584_v48 = vadd.f32 %v1583_v44, %v1361_v47 }
 0x36e   : > { %1366 = vst [vmem:[%s396_s5] sm:$0xff] %v1582_v46 }
 0x36f   : > { %1367 = vst [vmem:[%s396_s5 + $0x8] sm:$0xff] %v1584_v48 }
 0x370   : > { %1931 = shalt.err (!%p1928_p11)
}
 0x371   : > { %s1932_s3 = scalar_lea.hbm %s2447_s8, 256  ;;  %s1936_s14 = scalar_lea.hbm %s2498_s7, 512 }
 0x372   : > { %p1933_p2 = scmp.ne.s32.totalorder %s2447_s8, %s1932_s3  ;;  %p1937_p5 = scmp.lt.u32.totalorder %s2447_s8, %s2498_s7 }
 0x373   : > { %p1938_p7 = scmp.lt.u32.totalorder %s1936_s14, %s1932_s3  ;;  %p1940_p1 = scmp.lt.u32.totalorder %s1932_s3, %s2447_s8 }
 0x374   : > { %p1934_p8 = pnand %p1933_p2, %p2527_p3 }
 0x375   : > { %p1939_p4 = por %p1938_p7, %p1937_p5 }
 0x376   : > { %p1935_p13 = pneg %p1934_p8 }
 0x377   : > { %p1941_p6 = por %p1940_p1, %p1939_p4 }
 0x379   : > { %p1942_p0 = pnand %p1941_p6, %p1935_p13 }
 0x37b   : > { %1945 = shalt.err (!%p1942_p0)
}
 0x37c   : > { %1623 = dma.vmem_to_hbm [thread:$0]  (%p2527_p3), %s2449_s22, 256, %s2447_s8, %s1369_s30  }
 0x37d PF: > { %s1395_s28 = sand.u32 1, %s1988_s24   ;;  %p2528_p10 = scmp.ne.s32.totalorder %s2517_s2, 0 }
 0x37e   : > { %p2529_p12 = scmp.ge.s32.totalorder %s2000_s27, 2  ;;  %s1396_s11 = scalar_lea.sflag [#allocation5], %s1395_s28 }
 0x380   : > { %p1649_p9 = pnand %p2529_p12, %p2528_p10 }
 0x382   : > { %1983 = dma.done.wait (!%p1649_p9), %s1396_s11, 256  }
 0x383   : > { %1985 = vsyncadd (!%p1649_p9), %s1396_s11, 4294967040  ;;  %p25_p11 = scmp.ge.s32.totalorder %s2215_s13, 4   ;;  %s2530_s24 = smov %s1992_s25 }
 0x384   : > { %s2531_s25 = smov %s1996_s26  ;;  %s2532_s26 = smov %s2227_s12 }
 0x385   : > { %s2533_s27 = smov %s2215_s13  ;;  %27 = sbr.rel (!%p25_p11) target bundleno = 14 (0xe), region = 134 }
 0x38c   :  { %1401 = vsyncpa [#allocation4], 1 }
 0x38d   :  { %1403 = vsyncpa [#allocation4 + $0x1], 1 }
 0x38e   :  { %1404 = vsyncpa [#allocation7], 1 }
 0x38f   :  { %1406 = vsyncpa [#allocation7 + $0x1], 1 }
 0x390   :  { %1407 = vsyncpa [#allocation10], 1 }
 0x391   :  { %1408 = vsyncpa [#allocation13], 1 }
 0x392   :  { %1409 = vsyncpa [#allocation5], 1 }
 0x393   :  { %1411 = vsyncpa [#allocation5 + $0x1], 1 }

</bundles_post_ra>
